<compile_context>
chip_gen: v6e
topology: v6e:2x2x1
jax: 0.10.0
libtpu: 0.0.40
codegen_flags: <defaults>
</compile_context>

<pallas_src>
import functools
import math

import jax
import jax.numpy as jnp
from jax.experimental import pallas as pl
from jax.experimental.pallas import tpu as pltpu


@functools.lru_cache(maxsize=None)
def _vmem_budget():
    """Half the physical VMEM of the local chip, clamped to [32 MiB, 96 MiB]."""
    try:
        cap = pltpu.get_tpu_info().vmem_capacity_bytes
    except Exception:
        cap = 64 * 1024 * 1024  # conservative fallback (treat like v7x)
    return max(32 * 1024 * 1024, min(cap // 2, 96 * 1024 * 1024))


def _compiler_params(sem):
    return pltpu.CompilerParams(dimension_semantics=sem,
                                vmem_limit_bytes=_vmem_budget())


def _pick_tile(dim, cap):
    """Largest hardware-friendly tile <= cap that divides dim (falls back to full)."""
    if dim <= cap:
        return dim
    t = cap
    while t >= 128:
        if dim % t == 0:
            return t
        t //= 2
    # TODO(synk): use pl.cdiv grids with a masked tail instead of full-dim fallback
    # for awkward non-multiple-of-128 dims (can exceed the scoped VMEM limit).
    return dim


def _batch_block(B, target_steps=8):
    """Batch rows per attention grid step; keep >=2 steps so both v7x TCs get work."""
    if B <= 2:
        return 1
    bb = max(1, B // target_steps)
    while B % bb:
        bb -= 1
    return bb


# ---------------------------------------------------------------------------
# Generic tiled linear (fc_in / fc_out)
# ---------------------------------------------------------------------------

def _matmul_kernel(x_ref, w_ref, b_ref, o_ref, acc_ref, *, activation):
    k = pl.program_id(2)

    @pl.when(k == 0)
    def _():
        acc_ref[...] = jnp.zeros_like(acc_ref)

    # bf16 operands into the MXU, f32 accumulation.
    acc_ref[...] += jnp.dot(x_ref[...].astype(jnp.bfloat16), w_ref[...],
                            preferred_element_type=jnp.float32)

    @pl.when(k == pl.num_programs(2) - 1)
    def _():
        out = acc_ref[...] + b_ref[...].astype(jnp.float32)
        if activation == "relu":
            out = jnp.maximum(out, 0.0)
        o_ref[...] = out.astype(o_ref.dtype)


def linear(x, w, b, activation=None, *, tm_cap=256, tn_cap=256, tk_cap=512):
    """x: [M, K], w: [K, N] (bf16), b: [N] -> [M, N] (optionally fused ReLU)."""
    M, K = x.shape
    N = w.shape[1]
    tm = _pick_tile(M, tm_cap)
    tn = _pick_tile(N, tn_cap)
    tk = _pick_tile(K, tk_cap)
    b2 = b.reshape(1, N)
    bytes_accessed = (x.size * x.dtype.itemsize + w.size * w.dtype.itemsize
                      + M * N * x.dtype.itemsize)
    cost = pl.CostEstimate(flops=2 * M * N * K, transcendentals=0,
                           bytes_accessed=bytes_accessed)
    return pl.pallas_call(
        functools.partial(_matmul_kernel, activation=activation),
        out_shape=jax.ShapeDtypeStruct((M, N), x.dtype),
        grid=(M // tm, N // tn, K // tk),
        in_specs=[pl.BlockSpec((tm, tk), lambda i, j, k: (i, k)),
                  pl.BlockSpec((tk, tn), lambda i, j, k: (k, j)),
                  pl.BlockSpec((1, tn), lambda i, j, k: (0, j))],
        out_specs=pl.BlockSpec((tm, tn), lambda i, j, k: (i, j)),
        scratch_shapes=[pltpu.VMEM((tm, tn), jnp.float32)],
        compiler_params=_compiler_params(("parallel", "parallel", "arbitrary")),
        cost_estimate=cost,
    )(x, w, b2)


# ---------------------------------------------------------------------------
# Fused attention block: QKV proj -> per-head SDPA -> concat -> out proj -> add + LN
# ---------------------------------------------------------------------------

def _attn_layer_kernel(x_ref, wqkv_ref, bqkv_ref, wo_ref, bo_ref, g_ref, bln_ref,
                       o_ref, *, nhead, eps, bb):
    D = x_ref.shape[-1]
    Dh = D // nhead
    scale = 1.0 / math.sqrt(Dh)

    wqkv = wqkv_ref[...]            # [D, 3D] bf16
    bqkv = bqkv_ref[...]            # [1, 3D] f32
    wo = wo_ref[...]                # [D, D]  bf16
    bo = bo_ref[...]                # [1, D]  f32
    g = g_ref[...]                  # [1, D]  f32
    bln = bln_ref[...]              # [1, D]  f32

    def body(bi, carry):
        x = x_ref[bi]                                       # [S, D]
        # Packed QKV projection (single bf16 MXU pass, f32 accumulate).
        qkv = jnp.dot(x.astype(jnp.bfloat16), wqkv,
                      preferred_element_type=jnp.float32) + bqkv
        q = qkv[:, 0:D] * scale          # fold 1/sqrt(Dh) into q, not the [S,S] scores
        k = qkv[:, D:2 * D]
        v = qkv[:, 2 * D:3 * D]

        # TODO(synk): switch to flash-style (q_tile, k_tile) online-softmax tiling
        # when S grows large; at these shapes the full [S, S] scores fit trivially.
        heads = []
        for h in range(nhead):
            sl = slice(h * Dh, (h + 1) * Dh)
            q_h = q[:, sl].astype(jnp.bfloat16)
            k_h = k[:, sl].astype(jnp.bfloat16)
            v_h = v[:, sl].astype(jnp.bfloat16)
            s = jax.lax.dot_general(q_h, k_h, (((1,), (1,)), ((), ())),
                                    preferred_element_type=jnp.float32)
            m = jnp.max(s, axis=-1, keepdims=True)
            p = jnp.exp(s - m)
            l = jnp.sum(p, axis=-1, keepdims=True)
            o_h = jnp.dot(p.astype(jnp.bfloat16), v_h,
                          preferred_element_type=jnp.float32)
            heads.append(o_h * pl.reciprocal(l, approx=True))

        # Concat heads once, then a single full-D out-projection matmul.
        o_cat = jnp.concatenate(heads, axis=-1)             # [S, D] f32
        attn = jnp.dot(o_cat.astype(jnp.bfloat16), wo,
                       preferred_element_type=jnp.float32) + bo

        # Residual add + post-LayerNorm (f32 VPU math).
        z = x.astype(jnp.float32) + attn
        mean = jnp.mean(z, axis=-1, keepdims=True)
        var = jnp.mean((z - mean) ** 2, axis=-1, keepdims=True)
        zn = (z - mean) * jax.lax.rsqrt(var + eps)
        o_ref[bi] = (zn * g + bln).astype(o_ref.dtype)
        return carry

    if bb == 1:
        body(0, None)
    else:
        jax.lax.fori_loop(0, bb, body, None)


def attention_block(x, p, nhead, eps=1e-5):
    """x: [B, S, D] -> LayerNorm(x + MHA(x)) as one fused kernel."""
    B, S, D = x.shape
    bb = _batch_block(B)
    # TODO(synk): for v7x, mark the grid-invariant wqkv/wo BlockSpecs
    # pipeline_mode=pl.Buffered(1) to drop their second VMEM buffer; bf16 storage
    # already halves those bytes.
    return pl.pallas_call(
        functools.partial(_attn_layer_kernel, nhead=nhead, eps=eps, bb=bb),
        out_shape=jax.ShapeDtypeStruct((B, S, D), x.dtype),
        grid=(B // bb,),
        in_specs=[pl.BlockSpec((bb, S, D), lambda b: (b, 0, 0)),
                  pl.BlockSpec((D, 3 * D), lambda b: (0, 0)),
                  pl.BlockSpec((1, 3 * D), lambda b: (0, 0)),
                  pl.BlockSpec((D, D), lambda b: (0, 0)),
                  pl.BlockSpec((1, D), lambda b: (0, 0)),
                  pl.BlockSpec((1, D), lambda b: (0, 0)),
                  pl.BlockSpec((1, D), lambda b: (0, 0))],
        out_specs=pl.BlockSpec((bb, S, D), lambda b: (b, 0, 0)),
        compiler_params=_compiler_params(("parallel",)),
    )(x,
      p["in_proj_w"], p["in_proj_b"].reshape(1, 3 * D),
      p["out_proj_w"], p["out_proj_b"].reshape(1, D),
      p["ln1_g"].reshape(1, D), p["ln1_b"].reshape(1, D))


# ---------------------------------------------------------------------------
# Fused FFN block: linear1 + relu -> linear2 -> add + LN
# grid = (row tiles [parallel], dim_ff tiles [arbitrary reduction])
# ---------------------------------------------------------------------------

def _ffn_layer_kernel(x_ref, w1_ref, b1_ref, w2_ref, b2_ref, g_ref, bln_ref,
                      o_ref, acc_ref, *, eps):
    f = pl.program_id(1)

    @pl.when(f == 0)
    def _():
        acc_ref[...] = jnp.zeros_like(acc_ref)

    xb = x_ref[...].astype(jnp.bfloat16)
    h = jnp.dot(xb, w1_ref[...], preferred_element_type=jnp.float32)
    h = jnp.maximum(h + b1_ref[...], 0.0)
    acc_ref[...] += jnp.dot(h.astype(jnp.bfloat16), w2_ref[...],
                            preferred_element_type=jnp.float32)

    @pl.when(f == pl.num_programs(1) - 1)
    def _():
        ff = acc_ref[...] + b2_ref[...]
        z = x_ref[...].astype(jnp.float32) + ff
        mean = jnp.mean(z, axis=-1, keepdims=True)
        var = jnp.mean((z - mean) ** 2, axis=-1, keepdims=True)
        zn = (z - mean) * jax.lax.rsqrt(var + eps)
        o_ref[...] = (zn * g_ref[...] + bln_ref[...]).astype(o_ref.dtype)


def ffn_block(x2, p, eps=1e-5, *, tm_cap=512, tf_cap=None):
    """x2: [M, D] -> LayerNorm(x2 + W2 relu(W1 x2 + b1) + b2)."""
    M, D = x2.shape
    F = p["w1"].shape[1]
    if tf_cap is None:
        # Bigger dim_ff tiles when the chip has VMEM headroom (v5e/v6e).
        tf_cap = 1024 if _vmem_budget() >= 64 * 1024 * 1024 else 512
    tm = _pick_tile(M, tm_cap)
    tf = _pick_tile(F, tf_cap)
    return pl.pallas_call(
        functools.partial(_ffn_layer_kernel, eps=eps),
        out_shape=jax.ShapeDtypeStruct((M, D), x2.dtype),
        grid=(M // tm, F // tf),
        in_specs=[pl.BlockSpec((tm, D), lambda m, f: (m, 0)),
                  pl.BlockSpec((D, tf), lambda m, f: (0, f)),
                  pl.BlockSpec((1, tf), lambda m, f: (0, f)),
                  pl.BlockSpec((tf, D), lambda m, f: (f, 0)),
                  pl.BlockSpec((1, D), lambda m, f: (0, 0)),
                  pl.BlockSpec((1, D), lambda m, f: (0, 0)),
                  pl.BlockSpec((1, D), lambda m, f: (0, 0))],
        out_specs=pl.BlockSpec((tm, D), lambda m, f: (m, 0)),
        scratch_shapes=[pltpu.VMEM((tm, D), jnp.float32)],
        compiler_params=_compiler_params(("parallel", "arbitrary")),
    )(x2, p["w1"], p["b1"].reshape(1, F), p["w2"], p["b2"].reshape(1, D),
      p["ln2_g"].reshape(1, D), p["ln2_b"].reshape(1, D))


# ---------------------------------------------------------------------------
# Transformer encoder (post-LN, relu, batch_first) — PyTorch defaults
# ---------------------------------------------------------------------------

def encoder_layer(x, p, nhead):
    """One nn.TransformerEncoderLayer (norm_first=False, activation=relu).
    Dropout is identity (eval-mode semantics)."""
    # TODO(synk): dropout is intentionally a no-op (inference semantics).
    B, S, D = x.shape
    x = attention_block(x, p, nhead)
    x = ffn_block(x.reshape(B * S, D), p).reshape(B, S, D)
    return x


def transformer_forward(x, params, nhead, out_size):
    """Equivalent of Transformer.forward(x); x: [B, S, input_size]."""
    B, S, Din = x.shape
    D = params["fc_in_w"].shape[1]
    h = linear(x.reshape(B * S, Din), params["fc_in_w"], params["fc_in_b"])
    h = h.reshape(B, S, D)
    for lp in params["layers"]:
        h = encoder_layer(h, lp, nhead)
    h = h[:, -out_size:, :]                                   # [B, out_size, D]
    Bo, So, _ = h.shape
    # Fuse the final `[:, :, :-1]` into fc_out: drop the last weight/bias column
    # before the matmul instead of slicing the output afterwards.
    w_out = params["fc_out_w"][:, : Din - 1]
    b_out = params["fc_out_b"][: Din - 1]
    y = linear(h.reshape(Bo * So, D), w_out, b_out)
    return y.reshape(Bo, So, Din - 1)


# ---------------------------------------------------------------------------
# Deterministic parameter init (weights stored bf16 [in, out]; biases / LN f32)
# ---------------------------------------------------------------------------

def init_params(key, input_size, hidden_size, num_layers, dim_ff):
    def dense(k, fan_in, fan_out):
        w = jax.random.normal(k, (fan_in, fan_out), jnp.float32) * (1.0 / math.sqrt(fan_in))
        return w.astype(jnp.bfloat16)

    keys = jax.random.split(key, 2 + 6 * num_layers)
    params = {
        "fc_in_w": dense(keys[0], input_size, hidden_size),
        "fc_in_b": jnp.zeros((hidden_size,), jnp.float32),
        "fc_out_w": dense(keys[1], hidden_size, input_size),
        "fc_out_b": jnp.zeros((input_size,), jnp.float32),
        "layers": [],
    }
    for l in range(num_layers):
        k = keys[2 + 6 * l: 2 + 6 * (l + 1)]
        params["layers"].append({
            "in_proj_w": dense(k[0], hidden_size, 3 * hidden_size),
            "in_proj_b": jnp.zeros((3 * hidden_size,), jnp.float32),
            "out_proj_w": dense(k[1], hidden_size, hidden_size),
            "out_proj_b": jnp.zeros((hidden_size,), jnp.float32),
            "w1": dense(k[2], hidden_size, dim_ff),
            "b1": jnp.zeros((dim_ff,), jnp.float32),
            "w2": dense(k[3], dim_ff, hidden_size),
            "b2": jnp.zeros((hidden_size,), jnp.float32),
            "ln1_g": jnp.ones((hidden_size,), jnp.float32),
            "ln1_b": jnp.zeros((hidden_size,), jnp.float32),
            "ln2_g": jnp.ones((hidden_size,), jnp.float32),
            "ln2_b": jnp.zeros((hidden_size,), jnp.float32),
        })
    return params


# ---------------------------------------------------------------------------
# Demo
# ---------------------------------------------------------------------------

if __name__ == "__main__":
    # Module hyperparameters (small, consistent with the forward pass).
    input_size = 8
    hidden_size = 32
    num_layers = 2
    out_size = 4
    nhead = 4
    dim_ff = 2048          # nn.TransformerEncoderLayer default dim_feedforward
    B, S = 2, 8

    key = jax.random.PRNGKey(0)
    pkey, xkey = jax.random.split(key)
    params = init_params(pkey, input_size, hidden_size, num_layers, dim_ff)
    x = jax.random.normal(xkey, (B, S, input_size), jnp.float32)

    fwd = jax.jit(functools.partial(transformer_forward, nhead=nhead, out_size=out_size))
    y = fwd(x, params)
    jax.block_until_ready(y)
    assert y.shape == (B, out_size, input_size - 1), y.shape
    print("KERNEL_OK")
</pallas_src>

<mosaic_0001>
module attributes {stable_mosaic.version = 11 : i64} {
  func.func @_ffn_layer_kernel(%arg0: i32, %arg1: i32, %arg2: memref<16x32xf32, #tpu.memory_space<vmem>>, %arg3: memref<32x512xbf16, #tpu.memory_space<vmem>>, %arg4: memref<1x512xf32, #tpu.memory_space<vmem>>, %arg5: memref<512x32xbf16, #tpu.memory_space<vmem>>, %arg6: memref<1x32xf32, #tpu.memory_space<vmem>>, %arg7: memref<1x32xf32, #tpu.memory_space<vmem>>, %arg8: memref<1x32xf32, #tpu.memory_space<vmem>>, %arg9: memref<16x32xf32, #tpu.memory_space<vmem>>, %arg10: memref<16x32xf32, #tpu.memory_space<vmem>>) attributes {dimension_semantics = [#tpu.dimension_semantics<parallel>, #tpu.dimension_semantics<arbitrary>], iteration_bounds = array<i64: 1, 4>, scalar_prefetch = 0 : i64, scratch_operands = 1 : i64, tpu.core_type = #tpu.core_type<tc>, window_params = [{transform_indices = @transform_0, window_bounds = array<i64: 16, 32>}, {transform_indices = @transform_1, window_bounds = array<i64: 32, 512>}, {transform_indices = @transform_2, window_bounds = array<i64: 1, 512>}, {transform_indices = @transform_3, window_bounds = array<i64: 512, 32>}, {pipeline_mode = #tpu.pipeline_mode<synchronous>, transform_indices = @transform_4, window_bounds = array<i64: 1, 32>}, {pipeline_mode = #tpu.pipeline_mode<synchronous>, transform_indices = @transform_5, window_bounds = array<i64: 1, 32>}, {pipeline_mode = #tpu.pipeline_mode<synchronous>, transform_indices = @transform_6, window_bounds = array<i64: 1, 32>}, {transform_indices = @transform_7, window_bounds = array<i64: 16, 32>}]} {
    %c0_i32 = arith.constant 0 : i32
    %0 = arith.cmpi eq, %arg1, %c0_i32 : i32
    %1 = arith.extui %0 : i1 to i32
    %c0_i32_0 = arith.constant 0 : i32
    %2 = arith.cmpi ne, %1, %c0_i32_0 : i32
    scf.if %2 {
      %cst_15 = arith.constant 0.000000e+00 : f32
      %21 = vector.broadcast %cst_15 : f32 to vector<16x32xf32>
      %c0_16 = arith.constant 0 : index
      %c0_17 = arith.constant 0 : index
      %22 = vector.load %arg10[%c0_16, %c0_17] : memref<16x32xf32, #tpu.memory_space<vmem>>, vector<16x32xf32>
      tpu.vector_store %arg10[%c0_16, %c0_17], %21 {strides = array<i32>} : memref<16x32xf32, #tpu.memory_space<vmem>>, vector<16x32xf32>,
    } else {
    }
    %c0 = arith.constant 0 : index
    %c0_1 = arith.constant 0 : index
    %3 = vector.load %arg2[%c0, %c0_1] : memref<16x32xf32, #tpu.memory_space<vmem>>, vector<16x32xf32>
    %4 = arith.truncf %3 : vector<16x32xf32> to vector<16x32xbf16>
    %c0_2 = arith.constant 0 : index
    %c0_3 = arith.constant 0 : index
    %5 = vector.load %arg3[%c0_2, %c0_3] : memref<32x512xbf16, #tpu.memory_space<vmem>>, vector<32x512xbf16>
    %cst = arith.constant dense<0.000000e+00> : vector<16x512xf32>
    %6 = tpu.matmul %4, %5, %cst {dimension_numbers = #tpu.dot_dimension_numbers<[1], [0], [0], [1], [0, 0, 1, 1], [], []>} : vector<16x32xbf16>, vector<32x512xbf16>, vector<16x512xf32> -> vector<16x512xf32>
    %c0_4 = arith.constant 0 : index
    %c0_5 = arith.constant 0 : index
    %7 = vector.load %arg4[%c0_4, %c0_5] : memref<1x512xf32, #tpu.memory_space<vmem>>, vector<1x512xf32>
    %8 = vector.broadcast %7 : vector<1x512xf32> to vector<16x512xf32>
    %9 = arith.addf %6, %8 : vector<16x512xf32>
    %cst_6 = arith.constant 0.000000e+00 : f32
    %10 = vector.broadcast %cst_6 : f32 to vector<16x512xf32>
    %11 = arith.maximumf %9, %10 : vector<16x512xf32>
    %c0_7 = arith.constant 0 : index
    %c0_8 = arith.constant 0 : index
    %12 = vector.load %arg10[%c0_7, %c0_8] : memref<16x32xf32, #tpu.memory_space<vmem>>, vector<16x32xf32>
    %13 = arith.truncf %11 : vector<16x512xf32> to vector<16x512xbf16>
    %c0_9 = arith.constant 0 : index
    %c0_10 = arith.constant 0 : index
    %14 = vector.load %arg5[%c0_9, %c0_10] : memref<512x32xbf16, #tpu.memory_space<vmem>>, vector<512x32xbf16>
    %cst_11 = arith.constant dense<0.000000e+00> : vector<16x32xf32>
    %15 = tpu.matmul %13, %14, %cst_11 {dimension_numbers = #tpu.dot_dimension_numbers<[1], [0], [0], [1], [0, 0, 1, 1], [], []>} : vector<16x512xbf16>, vector<512x32xbf16>, vector<16x32xf32> -> vector<16x32xf32>
    %16 = arith.addf %12, %15 : vector<16x32xf32>
    %c0_12 = arith.constant 0 : index
    %c0_13 = arith.constant 0 : index
    %17 = vector.load %arg10[%c0_12, %c0_13] : memref<16x32xf32, #tpu.memory_space<vmem>>, vector<16x32xf32>
    tpu.vector_store %arg10[%c0_12, %c0_13], %16 {strides = array<i32>} : memref<16x32xf32, #tpu.memory_space<vmem>>, vector<16x32xf32>,
    %c3_i32 = arith.constant 3 : i32
    %18 = arith.cmpi eq, %arg1, %c3_i32 : i32
    %19 = arith.extui %18 : i1 to i32
    %c0_i32_14 = arith.constant 0 : i32
    %20 = arith.cmpi ne, %19, %c0_i32_14 : i32
    scf.if %20 {
      %c0_15 = arith.constant 0 : index
      %c0_16 = arith.constant 0 : index
      %21 = vector.load %arg10[%c0_15, %c0_16] : memref<16x32xf32, #tpu.memory_space<vmem>>, vector<16x32xf32>
      %c0_17 = arith.constant 0 : index
      %c0_18 = arith.constant 0 : index
      %22 = vector.load %arg6[%c0_17, %c0_18] : memref<1x32xf32, #tpu.memory_space<vmem>>, vector<1x32xf32>
      %23 = vector.broadcast %22 : vector<1x32xf32> to vector<16x32xf32>
      %24 = arith.addf %21, %23 : vector<16x32xf32>
      %c0_19 = arith.constant 0 : index
      %c0_20 = arith.constant 0 : index
      %25 = vector.load %arg2[%c0_19, %c0_20] : memref<16x32xf32, #tpu.memory_space<vmem>>, vector<16x32xf32>
      %26 = arith.addf %25, %24 : vector<16x32xf32>
      %cst_21 = arith.constant dense<0.000000e+00> : vector<16xf32>
      %27 = vector.multi_reduction <add>, %26, %cst_21 [1] : vector<16x32xf32> to vector<16xf32>
      %28 = vector.shape_cast %27 : vector<16xf32> to vector<16x1xf32>
      %cst_22 = arith.constant 3.200000e+01 : f32
      %29 = vector.broadcast %cst_22 : f32 to vector<16x1xf32>
      %30 = arith.divf %28, %29 : vector<16x1xf32>
      %31 = vector.broadcast %30 : vector<16x1xf32> to vector<16x32xf32>
      %32 = arith.subf %26, %31 : vector<16x32xf32>
      %33 = arith.mulf %32, %32 : vector<16x32xf32>
      %cst_23 = arith.constant dense<0.000000e+00> : vector<16xf32>
      %34 = vector.multi_reduction <add>, %33, %cst_23 [1] : vector<16x32xf32> to vector<16xf32>
      %35 = vector.shape_cast %34 : vector<16xf32> to vector<16x1xf32>
      %cst_24 = arith.constant 3.200000e+01 : f32
      %36 = vector.broadcast %cst_24 : f32 to vector<16x1xf32>
      %37 = arith.divf %35, %36 : vector<16x1xf32>
      %38 = vector.broadcast %30 : vector<16x1xf32> to vector<16x32xf32>
      %39 = arith.subf %26, %38 : vector<16x32xf32>
      %cst_25 = arith.constant 9.99999974E-6 : f32
      %40 = vector.broadcast %cst_25 : f32 to vector<16x1xf32>
      %41 = arith.addf %37, %40 : vector<16x1xf32>
      %42 = math.rsqrt %41 : vector<16x1xf32>
      %43 = vector.broadcast %42 : vector<16x1xf32> to vector<16x32xf32>
      %44 = arith.mulf %39, %43 : vector<16x32xf32>
      %c0_26 = arith.constant 0 : index
      %c0_27 = arith.constant 0 : index
      %45 = vector.load %arg7[%c0_26, %c0_27] : memref<1x32xf32, #tpu.memory_space<vmem>>, vector<1x32xf32>
      %46 = vector.broadcast %45 : vector<1x32xf32> to vector<16x32xf32>
      %47 = arith.mulf %44, %46 : vector<16x32xf32>
      %c0_28 = arith.constant 0 : index
      %c0_29 = arith.constant 0 : index
      %48 = vector.load %arg8[%c0_28, %c0_29] : memref<1x32xf32, #tpu.memory_space<vmem>>, vector<1x32xf32>
      %49 = vector.broadcast %48 : vector<1x32xf32> to vector<16x32xf32>
      %50 = arith.addf %47, %49 : vector<16x32xf32>
      %c0_30 = arith.constant 0 : index
      %c0_31 = arith.constant 0 : index
      %51 = vector.load %arg9[%c0_30, %c0_31] : memref<16x32xf32, #tpu.memory_space<vmem>>, vector<16x32xf32>
      tpu.vector_store %arg9[%c0_30, %c0_31], %50 {strides = array<i32>} : memref<16x32xf32, #tpu.memory_space<vmem>>, vector<16x32xf32>,
    } else {
    }
    return
  }
  func.func @transform_0(%arg0: i32, %arg1: i32) -> (i32, i32) {
    %c0_i32 = arith.constant 0 : i32
    %c0_i32_0 = arith.constant 0 : i32
    return %arg0, %c0_i32 : i32, i32
  }
  func.func @transform_1(%arg0: i32, %arg1: i32) -> (i32, i32) {
    %c0_i32 = arith.constant 0 : i32
    %c0_i32_0 = arith.constant 0 : i32
    return %c0_i32, %arg1 : i32, i32
  }
  func.func @transform_2(%arg0: i32, %arg1: i32) -> (i32, i32) {
    %c0_i32 = arith.constant 0 : i32
    %c0_i32_0 = arith.constant 0 : i32
    return %c0_i32, %arg1 : i32, i32
  }
  func.func @transform_3(%arg0: i32, %arg1: i32) -> (i32, i32) {
    %c0_i32 = arith.constant 0 : i32
    %c0_i32_0 = arith.constant 0 : i32
    return %arg1, %c0_i32 : i32, i32
  }
  func.func @transform_4(%arg0: i32, %arg1: i32) -> (i32, i32) {
    %c0_i32 = arith.constant 0 : i32
    %c0_i32_0 = arith.constant 0 : i32
    %c0_i32_1 = arith.constant 0 : i32
    return %c0_i32, %c0_i32_0 : i32, i32
  }
  func.func @transform_5(%arg0: i32, %arg1: i32) -> (i32, i32) {
    %c0_i32 = arith.constant 0 : i32
    %c0_i32_0 = arith.constant 0 : i32
    %c0_i32_1 = arith.constant 0 : i32
    return %c0_i32, %c0_i32_0 : i32, i32
  }
  func.func @transform_6(%arg0: i32, %arg1: i32) -> (i32, i32) {
    %c0_i32 = arith.constant 0 : i32
    %c0_i32_0 = arith.constant 0 : i32
    %c0_i32_1 = arith.constant 0 : i32
    return %c0_i32, %c0_i32_0 : i32, i32
  }
  func.func @transform_7(%arg0: i32, %arg1: i32) -> (i32, i32) {
    %c0_i32 = arith.constant 0 : i32
    %c0_i32_0 = arith.constant 0 : i32
    return %arg0, %c0_i32 : i32, i32
  }
}

module attributes {stable_mosaic.version = 11 : i64} {
  func.func @_attn_layer_kernel(%arg0: i32, %arg1: memref<1x8x32xf32, #tpu.memory_space<vmem>>, %arg2: memref<32x96xbf16, #tpu.memory_space<vmem>>, %arg3: memref<1x96xf32, #tpu.memory_space<vmem>>, %arg4: memref<32x32xbf16, #tpu.memory_space<vmem>>, %arg5: memref<1x32xf32, #tpu.memory_space<vmem>>, %arg6: memref<1x32xf32, #tpu.memory_space<vmem>>, %arg7: memref<1x32xf32, #tpu.memory_space<vmem>>, %arg8: memref<1x8x32xf32, #tpu.memory_space<vmem>>) attributes {dimension_semantics = [#tpu.dimension_semantics<parallel>], iteration_bounds = array<i64: 2>, scalar_prefetch = 0 : i64, scratch_operands = 0 : i64, tpu.core_type = #tpu.core_type<tc>, window_params = [{transform_indices = @transform_0, window_bounds = array<i64: 1, 8, 32>}, {pipeline_mode = #tpu.pipeline_mode<synchronous>, transform_indices = @transform_1, window_bounds = array<i64: 32, 96>}, {pipeline_mode = #tpu.pipeline_mode<synchronous>, transform_indices = @transform_2, window_bounds = array<i64: 1, 96>}, {pipeline_mode = #tpu.pipeline_mode<synchronous>, transform_indices = @transform_3, window_bounds = array<i64: 32, 32>}, {pipeline_mode = #tpu.pipeline_mode<synchronous>, transform_indices = @transform_4, window_bounds = array<i64: 1, 32>}, {pipeline_mode = #tpu.pipeline_mode<synchronous>, transform_indices = @transform_5, window_bounds = array<i64: 1, 32>}, {pipeline_mode = #tpu.pipeline_mode<synchronous>, transform_indices = @transform_6, window_bounds = array<i64: 1, 32>}, {transform_indices = @transform_7, window_bounds = array<i64: 1, 8, 32>}]} {
    %c0 = arith.constant 0 : index
    %c0_0 = arith.constant 0 : index
    %0 = vector.load %arg2[%c0, %c0_0] : memref<32x96xbf16, #tpu.memory_space<vmem>>, vector<32x96xbf16>
    %c0_1 = arith.constant 0 : index
    %c0_2 = arith.constant 0 : index
    %1 = vector.load %arg3[%c0_1, %c0_2] : memref<1x96xf32, #tpu.memory_space<vmem>>, vector<1x96xf32>
    %c0_3 = arith.constant 0 : index
    %c0_4 = arith.constant 0 : index
    %2 = vector.load %arg4[%c0_3, %c0_4] : memref<32x32xbf16, #tpu.memory_space<vmem>>, vector<32x32xbf16>
    %c0_5 = arith.constant 0 : index
    %c0_6 = arith.constant 0 : index
    %3 = vector.load %arg5[%c0_5, %c0_6] : memref<1x32xf32, #tpu.memory_space<vmem>>, vector<1x32xf32>
    %c0_7 = arith.constant 0 : index
    %c0_8 = arith.constant 0 : index
    %4 = vector.load %arg6[%c0_7, %c0_8] : memref<1x32xf32, #tpu.memory_space<vmem>>, vector<1x32xf32>
    %c0_9 = arith.constant 0 : index
    %c0_10 = arith.constant 0 : index
    %5 = vector.load %arg7[%c0_9, %c0_10] : memref<1x32xf32, #tpu.memory_space<vmem>>, vector<1x32xf32>
    %c0_11 = arith.constant 0 : index
    %c0_12 = arith.constant 0 : index
    %c0_13 = arith.constant 0 : index
    %6 = vector.load %arg1[%c0_11, %c0_12, %c0_13] : memref<1x8x32xf32, #tpu.memory_space<vmem>>, vector<1x8x32xf32>
    %7 = vector.shape_cast %6 : vector<1x8x32xf32> to vector<8x32xf32>
    %8 = arith.truncf %7 : vector<8x32xf32> to vector<8x32xbf16>
    %cst = arith.constant dense<0.000000e+00> : vector<8x96xf32>
    %9 = tpu.matmul %8, %0, %cst {dimension_numbers = #tpu.dot_dimension_numbers<[1], [0], [0], [1], [0, 0, 1, 1], [], []>} : vector<8x32xbf16>, vector<32x96xbf16>, vector<8x96xf32> -> vector<8x96xf32>
    %10 = vector.broadcast %1 : vector<1x96xf32> to vector<8x96xf32>
    %11 = arith.addf %9, %10 : vector<8x96xf32>
    %12 = vector.extract_strided_slice %11 {offsets = [0, 0], sizes = [8, 32], strides = [1, 1]} : vector<8x96xf32> to vector<8x32xf32>
    %cst_14 = arith.constant 0.353553385 : f32
    %13 = vector.broadcast %cst_14 : f32 to vector<8x32xf32>
    %14 = arith.mulf %12, %13 : vector<8x32xf32>
    %15 = vector.extract_strided_slice %11 {offsets = [0, 32], sizes = [8, 32], strides = [1, 1]} : vector<8x96xf32> to vector<8x32xf32>
    %16 = vector.extract_strided_slice %11 {offsets = [0, 64], sizes = [8, 32], strides = [1, 1]} : vector<8x96xf32> to vector<8x32xf32>
    %17 = vector.extract_strided_slice %14 {offsets = [0, 0], sizes = [8, 8], strides = [1, 1]} : vector<8x32xf32> to vector<8x8xf32>
    %18 = arith.truncf %17 : vector<8x8xf32> to vector<8x8xbf16>
    %19 = vector.extract_strided_slice %15 {offsets = [0, 0], sizes = [8, 8], strides = [1, 1]} : vector<8x32xf32> to vector<8x8xf32>
    %20 = arith.truncf %19 : vector<8x8xf32> to vector<8x8xbf16>
    %21 = vector.extract_strided_slice %16 {offsets = [0, 0], sizes = [8, 8], strides = [1, 1]} : vector<8x32xf32> to vector<8x8xf32>
    %22 = arith.truncf %21 : vector<8x8xf32> to vector<8x8xbf16>
    %cst_15 = arith.constant dense<0.000000e+00> : vector<8x8xf32>
    %23 = tpu.matmul %18, %20, %cst_15 {dimension_numbers = #tpu.dot_dimension_numbers<[1], [1], [0], [0], [0, 0, 1, 0], [], []>} : vector<8x8xbf16>, vector<8x8xbf16>, vector<8x8xf32> -> vector<8x8xf32>
    %cst_16 = arith.constant dense<0xFF800000> : vector<8xf32>
    %24 = vector.multi_reduction <maximumf>, %23, %cst_16 [1] : vector<8x8xf32> to vector<8xf32>
    %25 = vector.shape_cast %24 : vector<8xf32> to vector<8x1xf32>
    %26 = vector.broadcast %25 : vector<8x1xf32> to vector<8x8xf32>
    %27 = arith.subf %23, %26 : vector<8x8xf32>
    %28 = math.exp %27 : vector<8x8xf32>
    %cst_17 = arith.constant dense<0.000000e+00> : vector<8xf32>
    %29 = vector.multi_reduction <add>, %28, %cst_17 [1] : vector<8x8xf32> to vector<8xf32>
    %30 = vector.shape_cast %29 : vector<8xf32> to vector<8x1xf32>
    %31 = arith.truncf %28 : vector<8x8xf32> to vector<8x8xbf16>
    %cst_18 = arith.constant dense<0.000000e+00> : vector<8x8xf32>
    %32 = tpu.matmul %31, %22, %cst_18 {dimension_numbers = #tpu.dot_dimension_numbers<[1], [0], [0], [1], [0, 0, 1, 1], [], []>} : vector<8x8xbf16>, vector<8x8xbf16>, vector<8x8xf32> -> vector<8x8xf32>
    %33 = tpu.reciprocal %30 {approx = true} : vector<8x1xf32> -> vector<8x1xf32>
    %34 = vector.broadcast %33 : vector<8x1xf32> to vector<8x8xf32>
    %35 = arith.mulf %32, %34 : vector<8x8xf32>
    %36 = vector.extract_strided_slice %14 {offsets = [0, 8], sizes = [8, 8], strides = [1, 1]} : vector<8x32xf32> to vector<8x8xf32>
    %37 = arith.truncf %36 : vector<8x8xf32> to vector<8x8xbf16>
    %38 = vector.extract_strided_slice %15 {offsets = [0, 8], sizes = [8, 8], strides = [1, 1]} : vector<8x32xf32> to vector<8x8xf32>
    %39 = arith.truncf %38 : vector<8x8xf32> to vector<8x8xbf16>
    %40 = vector.extract_strided_slice %16 {offsets = [0, 8], sizes = [8, 8], strides = [1, 1]} : vector<8x32xf32> to vector<8x8xf32>
    %41 = arith.truncf %40 : vector<8x8xf32> to vector<8x8xbf16>
    %cst_19 = arith.constant dense<0.000000e+00> : vector<8x8xf32>
    %42 = tpu.matmul %37, %39, %cst_19 {dimension_numbers = #tpu.dot_dimension_numbers<[1], [1], [0], [0], [0, 0, 1, 0], [], []>} : vector<8x8xbf16>, vector<8x8xbf16>, vector<8x8xf32> -> vector<8x8xf32>
    %cst_20 = arith.constant dense<0xFF800000> : vector<8xf32>
    %43 = vector.multi_reduction <maximumf>, %42, %cst_20 [1] : vector<8x8xf32> to vector<8xf32>
    %44 = vector.shape_cast %43 : vector<8xf32> to vector<8x1xf32>
    %45 = vector.broadcast %44 : vector<8x1xf32> to vector<8x8xf32>
    %46 = arith.subf %42, %45 : vector<8x8xf32>
    %47 = math.exp %46 : vector<8x8xf32>
    %cst_21 = arith.constant dense<0.000000e+00> : vector<8xf32>
    %48 = vector.multi_reduction <add>, %47, %cst_21 [1] : vector<8x8xf32> to vector<8xf32>
    %49 = vector.shape_cast %48 : vector<8xf32> to vector<8x1xf32>
    %50 = arith.truncf %47 : vector<8x8xf32> to vector<8x8xbf16>
    %cst_22 = arith.constant dense<0.000000e+00> : vector<8x8xf32>
    %51 = tpu.matmul %50, %41, %cst_22 {dimension_numbers = #tpu.dot_dimension_numbers<[1], [0], [0], [1], [0, 0, 1, 1], [], []>} : vector<8x8xbf16>, vector<8x8xbf16>, vector<8x8xf32> -> vector<8x8xf32>
    %52 = tpu.reciprocal %49 {approx = true} : vector<8x1xf32> -> vector<8x1xf32>
    %53 = vector.broadcast %52 : vector<8x1xf32> to vector<8x8xf32>
    %54 = arith.mulf %51, %53 : vector<8x8xf32>
    %55 = vector.extract_strided_slice %14 {offsets = [0, 16], sizes = [8, 8], strides = [1, 1]} : vector<8x32xf32> to vector<8x8xf32>
    %56 = arith.truncf %55 : vector<8x8xf32> to vector<8x8xbf16>
    %57 = vector.extract_strided_slice %15 {offsets = [0, 16], sizes = [8, 8], strides = [1, 1]} : vector<8x32xf32> to vector<8x8xf32>
    %58 = arith.truncf %57 : vector<8x8xf32> to vector<8x8xbf16>
    %59 = vector.extract_strided_slice %16 {offsets = [0, 16], sizes = [8, 8], strides = [1, 1]} : vector<8x32xf32> to vector<8x8xf32>
    %60 = arith.truncf %59 : vector<8x8xf32> to vector<8x8xbf16>
    %cst_23 = arith.constant dense<0.000000e+00> : vector<8x8xf32>
    %61 = tpu.matmul %56, %58, %cst_23 {dimension_numbers = #tpu.dot_dimension_numbers<[1], [1], [0], [0], [0, 0, 1, 0], [], []>} : vector<8x8xbf16>, vector<8x8xbf16>, vector<8x8xf32> -> vector<8x8xf32>
    %cst_24 = arith.constant dense<0xFF800000> : vector<8xf32>
    %62 = vector.multi_reduction <maximumf>, %61, %cst_24 [1] : vector<8x8xf32> to vector<8xf32>
    %63 = vector.shape_cast %62 : vector<8xf32> to vector<8x1xf32>
    %64 = vector.broadcast %63 : vector<8x1xf32> to vector<8x8xf32>
    %65 = arith.subf %61, %64 : vector<8x8xf32>
    %66 = math.exp %65 : vector<8x8xf32>
    %cst_25 = arith.constant dense<0.000000e+00> : vector<8xf32>
    %67 = vector.multi_reduction <add>, %66, %cst_25 [1] : vector<8x8xf32> to vector<8xf32>
    %68 = vector.shape_cast %67 : vector<8xf32> to vector<8x1xf32>
    %69 = arith.truncf %66 : vector<8x8xf32> to vector<8x8xbf16>
    %cst_26 = arith.constant dense<0.000000e+00> : vector<8x8xf32>
    %70 = tpu.matmul %69, %60, %cst_26 {dimension_numbers = #tpu.dot_dimension_numbers<[1], [0], [0], [1], [0, 0, 1, 1], [], []>} : vector<8x8xbf16>, vector<8x8xbf16>, vector<8x8xf32> -> vector<8x8xf32>
    %71 = tpu.reciprocal %68 {approx = true} : vector<8x1xf32> -> vector<8x1xf32>
    %72 = vector.broadcast %71 : vector<8x1xf32> to vector<8x8xf32>
    %73 = arith.mulf %70, %72 : vector<8x8xf32>
    %74 = vector.extract_strided_slice %14 {offsets = [0, 24], sizes = [8, 8], strides = [1, 1]} : vector<8x32xf32> to vector<8x8xf32>
    %75 = arith.truncf %74 : vector<8x8xf32> to vector<8x8xbf16>
    %76 = vector.extract_strided_slice %15 {offsets = [0, 24], sizes = [8, 8], strides = [1, 1]} : vector<8x32xf32> to vector<8x8xf32>
    %77 = arith.truncf %76 : vector<8x8xf32> to vector<8x8xbf16>
    %78 = vector.extract_strided_slice %16 {offsets = [0, 24], sizes = [8, 8], strides = [1, 1]} : vector<8x32xf32> to vector<8x8xf32>
    %79 = arith.truncf %78 : vector<8x8xf32> to vector<8x8xbf16>
    %cst_27 = arith.constant dense<0.000000e+00> : vector<8x8xf32>
    %80 = tpu.matmul %75, %77, %cst_27 {dimension_numbers = #tpu.dot_dimension_numbers<[1], [1], [0], [0], [0, 0, 1, 0], [], []>} : vector<8x8xbf16>, vector<8x8xbf16>, vector<8x8xf32> -> vector<8x8xf32>
    %cst_28 = arith.constant dense<0xFF800000> : vector<8xf32>
    %81 = vector.multi_reduction <maximumf>, %80, %cst_28 [1] : vector<8x8xf32> to vector<8xf32>
    %82 = vector.shape_cast %81 : vector<8xf32> to vector<8x1xf32>
    %83 = vector.broadcast %82 : vector<8x1xf32> to vector<8x8xf32>
    %84 = arith.subf %80, %83 : vector<8x8xf32>
    %85 = math.exp %84 : vector<8x8xf32>
    %cst_29 = arith.constant dense<0.000000e+00> : vector<8xf32>
    %86 = vector.multi_reduction <add>, %85, %cst_29 [1] : vector<8x8xf32> to vector<8xf32>
    %87 = vector.shape_cast %86 : vector<8xf32> to vector<8x1xf32>
    %88 = arith.truncf %85 : vector<8x8xf32> to vector<8x8xbf16>
    %cst_30 = arith.constant dense<0.000000e+00> : vector<8x8xf32>
    %89 = tpu.matmul %88, %79, %cst_30 {dimension_numbers = #tpu.dot_dimension_numbers<[1], [0], [0], [1], [0, 0, 1, 1], [], []>} : vector<8x8xbf16>, vector<8x8xbf16>, vector<8x8xf32> -> vector<8x8xf32>
    %90 = tpu.reciprocal %87 {approx = true} : vector<8x1xf32> -> vector<8x1xf32>
    %91 = vector.broadcast %90 : vector<8x1xf32> to vector<8x8xf32>
    %92 = arith.mulf %89, %91 : vector<8x8xf32>
    %93 = tpu.concatenate %35, %54, %73, %92 in 1 : vector<8x8xf32>, vector<8x8xf32>, vector<8x8xf32>, vector<8x8xf32> -> vector<8x32xf32>
    %94 = arith.truncf %93 : vector<8x32xf32> to vector<8x32xbf16>
    %cst_31 = arith.constant dense<0.000000e+00> : vector<8x32xf32>
    %95 = tpu.matmul %94, %2, %cst_31 {dimension_numbers = #tpu.dot_dimension_numbers<[1], [0], [0], [1], [0, 0, 1, 1], [], []>} : vector<8x32xbf16>, vector<32x32xbf16>, vector<8x32xf32> -> vector<8x32xf32>
    %96 = vector.broadcast %3 : vector<1x32xf32> to vector<8x32xf32>
    %97 = arith.addf %95, %96 : vector<8x32xf32>
    %98 = arith.addf %7, %97 : vector<8x32xf32>
    %cst_32 = arith.constant dense<0.000000e+00> : vector<8xf32>
    %99 = vector.multi_reduction <add>, %98, %cst_32 [1] : vector<8x32xf32> to vector<8xf32>
    %100 = vector.shape_cast %99 : vector<8xf32> to vector<8x1xf32>
    %cst_33 = arith.constant 3.200000e+01 : f32
    %101 = vector.broadcast %cst_33 : f32 to vector<8x1xf32>
    %102 = arith.divf %100, %101 : vector<8x1xf32>
    %103 = vector.broadcast %102 : vector<8x1xf32> to vector<8x32xf32>
    %104 = arith.subf %98, %103 : vector<8x32xf32>
    %105 = arith.mulf %104, %104 : vector<8x32xf32>
    %cst_34 = arith.constant dense<0.000000e+00> : vector<8xf32>
    %106 = vector.multi_reduction <add>, %105, %cst_34 [1] : vector<8x32xf32> to vector<8xf32>
    %107 = vector.shape_cast %106 : vector<8xf32> to vector<8x1xf32>
    %cst_35 = arith.constant 3.200000e+01 : f32
    %108 = vector.broadcast %cst_35 : f32 to vector<8x1xf32>
    %109 = arith.divf %107, %108 : vector<8x1xf32>
    %110 = vector.broadcast %102 : vector<8x1xf32> to vector<8x32xf32>
    %111 = arith.subf %98, %110 : vector<8x32xf32>
    %cst_36 = arith.constant 9.99999974E-6 : f32
    %112 = vector.broadcast %cst_36 : f32 to vector<8x1xf32>
    %113 = arith.addf %109, %112 : vector<8x1xf32>
    %114 = math.rsqrt %113 : vector<8x1xf32>
    %115 = vector.broadcast %114 : vector<8x1xf32> to vector<8x32xf32>
    %116 = arith.mulf %111, %115 : vector<8x32xf32>
    %117 = vector.broadcast %4 : vector<1x32xf32> to vector<8x32xf32>
    %118 = arith.mulf %116, %117 : vector<8x32xf32>
    %119 = vector.broadcast %5 : vector<1x32xf32> to vector<8x32xf32>
    %120 = arith.addf %118, %119 : vector<8x32xf32>
    %c0_37 = arith.constant 0 : index
    %c0_38 = arith.constant 0 : index
    %c0_39 = arith.constant 0 : index
    %121 = vector.load %arg8[%c0_37, %c0_38, %c0_39] : memref<1x8x32xf32, #tpu.memory_space<vmem>>, vector<1x8x32xf32>
    %122 = vector.shape_cast %121 : vector<1x8x32xf32> to vector<8x32xf32>
    %123 = vector.shape_cast %120 : vector<8x32xf32> to vector<1x8x32xf32>
    tpu.vector_store %arg8[%c0_37, %c0_38, %c0_39], %123 {strides = array<i32>} : memref<1x8x32xf32, #tpu.memory_space<vmem>>, vector<1x8x32xf32>,
    return
  }
  func.func @transform_0(%arg0: i32) -> (i32, i32, i32) {
    %c0_i32 = arith.constant 0 : i32
    %c0_i32_0 = arith.constant 0 : i32
    %c0_i32_1 = arith.constant 0 : i32
    return %arg0, %c0_i32, %c0_i32_0 : i32, i32, i32
  }
  func.func @transform_1(%arg0: i32) -> (i32, i32) {
    %c0_i32 = arith.constant 0 : i32
    %c0_i32_0 = arith.constant 0 : i32
    %c0_i32_1 = arith.constant 0 : i32
    return %c0_i32, %c0_i32_0 : i32, i32
  }
  func.func @transform_2(%arg0: i32) -> (i32, i32) {
    %c0_i32 = arith.constant 0 : i32
    %c0_i32_0 = arith.constant 0 : i32
    %c0_i32_1 = arith.constant 0 : i32
    return %c0_i32, %c0_i32_0 : i32, i32
  }
  func.func @transform_3(%arg0: i32) -> (i32, i32) {
    %c0_i32 = arith.constant 0 : i32
    %c0_i32_0 = arith.constant 0 : i32
    %c0_i32_1 = arith.constant 0 : i32
    return %c0_i32, %c0_i32_0 : i32, i32
  }
  func.func @transform_4(%arg0: i32) -> (i32, i32) {
    %c0_i32 = arith.constant 0 : i32
    %c0_i32_0 = arith.constant 0 : i32
    %c0_i32_1 = arith.constant 0 : i32
    return %c0_i32, %c0_i32_0 : i32, i32
  }
  func.func @transform_5(%arg0: i32) -> (i32, i32) {
    %c0_i32 = arith.constant 0 : i32
    %c0_i32_0 = arith.constant 0 : i32
    %c0_i32_1 = arith.constant 0 : i32
    return %c0_i32, %c0_i32_0 : i32, i32
  }
  func.func @transform_6(%arg0: i32) -> (i32, i32) {
    %c0_i32 = arith.constant 0 : i32
    %c0_i32_0 = arith.constant 0 : i32
    %c0_i32_1 = arith.constant 0 : i32
    return %c0_i32, %c0_i32_0 : i32, i32
  }
  func.func @transform_7(%arg0: i32) -> (i32, i32, i32) {
    %c0_i32 = arith.constant 0 : i32
    %c0_i32_0 = arith.constant 0 : i32
    %c0_i32_1 = arith.constant 0 : i32
    return %arg0, %c0_i32, %c0_i32_0 : i32, i32, i32
  }
}

module attributes {stable_mosaic.version = 11 : i64} {
  func.func @_matmul_kernel(%arg0: i32, %arg1: i32, %arg2: i32, %arg3: memref<16x8xf32, #tpu.memory_space<vmem>>, %arg4: memref<8x32xbf16, #tpu.memory_space<vmem>>, %arg5: memref<1x32xf32, #tpu.memory_space<vmem>>, %arg6: memref<16x32xf32, #tpu.memory_space<vmem>>, %arg7: memref<16x32xf32, #tpu.memory_space<vmem>>) attributes {dimension_semantics = [#tpu.dimension_semantics<parallel>, #tpu.dimension_semantics<parallel>, #tpu.dimension_semantics<arbitrary>], iteration_bounds = array<i64: 1, 1, 1>, scalar_prefetch = 0 : i64, scratch_operands = 1 : i64, tpu.core_type = #tpu.core_type<tc>, window_params = [{transform_indices = @transform_0, window_bounds = array<i64: 16, 8>}, {transform_indices = @transform_1, window_bounds = array<i64: 8, 32>}, {transform_indices = @transform_2, window_bounds = array<i64: 1, 32>}, {transform_indices = @transform_3, window_bounds = array<i64: 16, 32>}]} {
    %c0_i32 = arith.constant 0 : i32
    %0 = arith.cmpi eq, %arg2, %c0_i32 : i32
    %1 = arith.extui %0 : i1 to i32
    %c0_i32_0 = arith.constant 0 : i32
    %2 = arith.cmpi ne, %1, %c0_i32_0 : i32
    scf.if %2 {
      %cst_10 = arith.constant 0.000000e+00 : f32
      %13 = vector.broadcast %cst_10 : f32 to vector<16x32xf32>
      %c0_11 = arith.constant 0 : index
      %c0_12 = arith.constant 0 : index
      %14 = vector.load %arg7[%c0_11, %c0_12] : memref<16x32xf32, #tpu.memory_space<vmem>>, vector<16x32xf32>
      tpu.vector_store %arg7[%c0_11, %c0_12], %13 {strides = array<i32>} : memref<16x32xf32, #tpu.memory_space<vmem>>, vector<16x32xf32>,
    } else {
    }
    %c0 = arith.constant 0 : index
    %c0_1 = arith.constant 0 : index
    %3 = vector.load %arg7[%c0, %c0_1] : memref<16x32xf32, #tpu.memory_space<vmem>>, vector<16x32xf32>
    %c0_2 = arith.constant 0 : index
    %c0_3 = arith.constant 0 : index
    %4 = vector.load %arg3[%c0_2, %c0_3] : memref<16x8xf32, #tpu.memory_space<vmem>>, vector<16x8xf32>
    %5 = arith.truncf %4 : vector<16x8xf32> to vector<16x8xbf16>
    %c0_4 = arith.constant 0 : index
    %c0_5 = arith.constant 0 : index
    %6 = vector.load %arg4[%c0_4, %c0_5] : memref<8x32xbf16, #tpu.memory_space<vmem>>, vector<8x32xbf16>
    %cst = arith.constant dense<0.000000e+00> : vector<16x32xf32>
    %7 = tpu.matmul %5, %6, %cst {dimension_numbers = #tpu.dot_dimension_numbers<[1], [0], [0], [1], [0, 0, 1, 1], [], []>} : vector<16x8xbf16>, vector<8x32xbf16>, vector<16x32xf32> -> vector<16x32xf32>
    %8 = arith.addf %3, %7 : vector<16x32xf32>
    %c0_6 = arith.constant 0 : index
    %c0_7 = arith.constant 0 : index
    %9 = vector.load %arg7[%c0_6, %c0_7] : memref<16x32xf32, #tpu.memory_space<vmem>>, vector<16x32xf32>
    tpu.vector_store %arg7[%c0_6, %c0_7], %8 {strides = array<i32>} : memref<16x32xf32, #tpu.memory_space<vmem>>, vector<16x32xf32>,
    %c0_i32_8 = arith.constant 0 : i32
    %10 = arith.cmpi eq, %arg2, %c0_i32_8 : i32
    %11 = arith.extui %10 : i1 to i32
    %c0_i32_9 = arith.constant 0 : i32
    %12 = arith.cmpi ne, %11, %c0_i32_9 : i32
    scf.if %12 {
      %c0_10 = arith.constant 0 : index
      %c0_11 = arith.constant 0 : index
      %13 = vector.load %arg7[%c0_10, %c0_11] : memref<16x32xf32, #tpu.memory_space<vmem>>, vector<16x32xf32>
      %c0_12 = arith.constant 0 : index
      %c0_13 = arith.constant 0 : index
      %14 = vector.load %arg5[%c0_12, %c0_13] : memref<1x32xf32, #tpu.memory_space<vmem>>, vector<1x32xf32>
      %15 = vector.broadcast %14 : vector<1x32xf32> to vector<16x32xf32>
      %16 = arith.addf %13, %15 : vector<16x32xf32>
      %c0_14 = arith.constant 0 : index
      %c0_15 = arith.constant 0 : index
      %17 = vector.load %arg6[%c0_14, %c0_15] : memref<16x32xf32, #tpu.memory_space<vmem>>, vector<16x32xf32>
      tpu.vector_store %arg6[%c0_14, %c0_15], %16 {strides = array<i32>} : memref<16x32xf32, #tpu.memory_space<vmem>>, vector<16x32xf32>,
    } else {
    }
    return
  }
  func.func @transform_0(%arg0: i32, %arg1: i32, %arg2: i32) -> (i32, i32) {
    %c0_i32 = arith.constant 0 : i32
    return %arg0, %arg2 : i32, i32
  }
  func.func @transform_1(%arg0: i32, %arg1: i32, %arg2: i32) -> (i32, i32) {
    %c0_i32 = arith.constant 0 : i32
    return %arg2, %arg1 : i32, i32
  }
  func.func @transform_2(%arg0: i32, %arg1: i32, %arg2: i32) -> (i32, i32) {
    %c0_i32 = arith.constant 0 : i32
    %c0_i32_0 = arith.constant 0 : i32
    return %c0_i32, %arg1 : i32, i32
  }
  func.func @transform_3(%arg0: i32, %arg1: i32, %arg2: i32) -> (i32, i32) {
    %c0_i32 = arith.constant 0 : i32
    return %arg0, %arg1 : i32, i32
  }
}

module attributes {stable_mosaic.version = 11 : i64} {
  func.func @_matmul_kernel(%arg0: i32, %arg1: i32, %arg2: i32, %arg3: memref<8x32xf32, #tpu.memory_space<vmem>>, %arg4: memref<32x7xbf16, #tpu.memory_space<vmem>>, %arg5: memref<1x7xf32, #tpu.memory_space<vmem>>, %arg6: memref<8x7xf32, #tpu.memory_space<vmem>>, %arg7: memref<8x7xf32, #tpu.memory_space<vmem>>) attributes {dimension_semantics = [#tpu.dimension_semantics<parallel>, #tpu.dimension_semantics<parallel>, #tpu.dimension_semantics<arbitrary>], iteration_bounds = array<i64: 1, 1, 1>, scalar_prefetch = 0 : i64, scratch_operands = 1 : i64, tpu.core_type = #tpu.core_type<tc>, window_params = [{transform_indices = @transform_0, window_bounds = array<i64: 8, 32>}, {transform_indices = @transform_1, window_bounds = array<i64: 32, 7>}, {transform_indices = @transform_2, window_bounds = array<i64: 1, 7>}, {transform_indices = @transform_3, window_bounds = array<i64: 8, 7>}]} {
    %c0_i32 = arith.constant 0 : i32
    %0 = arith.cmpi eq, %arg2, %c0_i32 : i32
    %1 = arith.extui %0 : i1 to i32
    %c0_i32_0 = arith.constant 0 : i32
    %2 = arith.cmpi ne, %1, %c0_i32_0 : i32
    scf.if %2 {
      %cst_10 = arith.constant 0.000000e+00 : f32
      %13 = vector.broadcast %cst_10 : f32 to vector<8x7xf32>
      %c0_11 = arith.constant 0 : index
      %c0_12 = arith.constant 0 : index
      %14 = vector.load %arg7[%c0_11, %c0_12] : memref<8x7xf32, #tpu.memory_space<vmem>>, vector<8x7xf32>
      tpu.vector_store %arg7[%c0_11, %c0_12], %13 {strides = array<i32>} : memref<8x7xf32, #tpu.memory_space<vmem>>, vector<8x7xf32>,
    } else {
    }
    %c0 = arith.constant 0 : index
    %c0_1 = arith.constant 0 : index
    %3 = vector.load %arg7[%c0, %c0_1] : memref<8x7xf32, #tpu.memory_space<vmem>>, vector<8x7xf32>
    %c0_2 = arith.constant 0 : index
    %c0_3 = arith.constant 0 : index
    %4 = vector.load %arg3[%c0_2, %c0_3] : memref<8x32xf32, #tpu.memory_space<vmem>>, vector<8x32xf32>
    %5 = arith.truncf %4 : vector<8x32xf32> to vector<8x32xbf16>
    %c0_4 = arith.constant 0 : index
    %c0_5 = arith.constant 0 : index
    %6 = vector.load %arg4[%c0_4, %c0_5] : memref<32x7xbf16, #tpu.memory_space<vmem>>, vector<32x7xbf16>
    %cst = arith.constant dense<0.000000e+00> : vector<8x7xf32>
    %7 = tpu.matmul %5, %6, %cst {dimension_numbers = #tpu.dot_dimension_numbers<[1], [0], [0], [1], [0, 0, 1, 1], [], []>} : vector<8x32xbf16>, vector<32x7xbf16>, vector<8x7xf32> -> vector<8x7xf32>
    %8 = arith.addf %3, %7 : vector<8x7xf32>
    %c0_6 = arith.constant 0 : index
    %c0_7 = arith.constant 0 : index
    %9 = vector.load %arg7[%c0_6, %c0_7] : memref<8x7xf32, #tpu.memory_space<vmem>>, vector<8x7xf32>
    tpu.vector_store %arg7[%c0_6, %c0_7], %8 {strides = array<i32>} : memref<8x7xf32, #tpu.memory_space<vmem>>, vector<8x7xf32>,
    %c0_i32_8 = arith.constant 0 : i32
    %10 = arith.cmpi eq, %arg2, %c0_i32_8 : i32
    %11 = arith.extui %10 : i1 to i32
    %c0_i32_9 = arith.constant 0 : i32
    %12 = arith.cmpi ne, %11, %c0_i32_9 : i32
    scf.if %12 {
      %c0_10 = arith.constant 0 : index
      %c0_11 = arith.constant 0 : index
      %13 = vector.load %arg7[%c0_10, %c0_11] : memref<8x7xf32, #tpu.memory_space<vmem>>, vector<8x7xf32>
      %c0_12 = arith.constant 0 : index
      %c0_13 = arith.constant 0 : index
      %14 = vector.load %arg5[%c0_12, %c0_13] : memref<1x7xf32, #tpu.memory_space<vmem>>, vector<1x7xf32>
      %15 = vector.broadcast %14 : vector<1x7xf32> to vector<8x7xf32>
      %16 = arith.addf %13, %15 : vector<8x7xf32>
      %c0_14 = arith.constant 0 : index
      %c0_15 = arith.constant 0 : index
      %17 = vector.load %arg6[%c0_14, %c0_15] : memref<8x7xf32, #tpu.memory_space<vmem>>, vector<8x7xf32>
      tpu.vector_store %arg6[%c0_14, %c0_15], %16 {strides = array<i32>} : memref<8x7xf32, #tpu.memory_space<vmem>>, vector<8x7xf32>,
    } else {
    }
    return
  }
  func.func @transform_0(%arg0: i32, %arg1: i32, %arg2: i32) -> (i32, i32) {
    %c0_i32 = arith.constant 0 : i32
    return %arg0, %arg2 : i32, i32
  }
  func.func @transform_1(%arg0: i32, %arg1: i32, %arg2: i32) -> (i32, i32) {
    %c0_i32 = arith.constant 0 : i32
    return %arg2, %arg1 : i32, i32
  }
  func.func @transform_2(%arg0: i32, %arg1: i32, %arg2: i32) -> (i32, i32) {
    %c0_i32 = arith.constant 0 : i32
    %c0_i32_0 = arith.constant 0 : i32
    return %c0_i32, %arg1 : i32, i32
  }
  func.func @transform_3(%arg0: i32, %arg1: i32, %arg2: i32) -> (i32, i32) {
    %c0_i32 = arith.constant 0 : i32
    return %arg0, %arg1 : i32, i32
  }
}

</mosaic_0001>

<bundles_post_ra>
// kernel: transformer_forward.6
= control target key start
LH: loop header
LB: loop body
LE: loop exit
PB: predicated region body
PF: predicated region fallthrough
CT: control target
= control target key end

     0   :  { %vm19_vm0 = vcmask 261120   ;;  %vm32_vm1 = vcmask 1043456   ;;  %v114_v0 = vmov 0.0   ;;  %vm115_vm2 = vmmov 0   ;;  %s160_s1 = inlined_call_operand.vmem [shape: bf16[8,32], index: 1, kind: input, shape index: {}]   ;;  %s161_s0 = inlined_call_operand.vmem [shape: f32[16,8], index: 0, kind: input, shape index: {}]   ;;  %s162_s2 = inlined_call_operand.vmem [shape: f32[1,32], index: 2, kind: input, shape index: {}]   ;;  %s163_s3 = inlined_call_operand.vmem [shape: f32[16,32], index: 3, kind: output, shape index: {}]  }
   0x1   :  { %20 = vst.msk [vmem:[#allocation2] sm:$0xff] %vm19_vm0, %v114_v0  ;;  %21 = vst.msk [vmem:[#allocation2 + $0x8] sm:$0xff] %vm19_vm0, %v114_v0  ;;  %106 = vmatprep.subr.bf16.mxu0 %v114_v0  ;;  %v27_v1 = vld [vmem:[%s160_s1] sm:$0xf]  ;;  %108 = vmatprep.mubr.msk.bf16.mxu0 %vm115_vm2, %v114_v0  ;;  %v25_v3 = vld [vmem:[%s161_s0 + $0x8] sm:$0xff]  ;;  %vm28_vm3 = vcmask 64512  }
   0x2   :  { %v24_v2 = vld [vmem:[%s161_s0] sm:$0xff]  ;;  %v34_v4 = vsel %vm32_vm1, %v27_v1, 0 }
   0x3   :  { %v26_v5 = vpack.c.bf16 %v25_v3, %v24_v2  ;;  %107 = vmatpush3.bf16.msra.mxu0 %v34_v4  ;;  %v103_v14 = vld [vmem:[%s162_s2] ss:$0 sm:$0xff] }
   0x6   :  { %109 = vmatmul.mubr.msk.bf16.vlgmr.msra.gmra.mxu0 %vm28_vm3, %v26_v5 }
   0x8   :  { %v22_v6 = vld [vmem:[#allocation2] sm:$0xff]  ;;  %v23_v10 = vld [vmem:[#allocation2 + $0x8] sm:$0xff] }
  0xc6   :  { %v70_v7 = vpop.f32.mrf.mxu0 }
  0xc7   :  { %v77_v8 = vadd.f32 %v70_v7, %v22_v6 }
  0xc8   :  { %v110_v9 = vpop.f32.mrf.mxu0 }
  0xc9   :  { %80 = vst.msk [vmem:[#allocation2] sm:$0xff] %vm19_vm0, %v77_v8 }
  0xca   :  { %v73_v11 = vpop.f32.mrf.mxu0 }
  0xcb   :  { %v78_v12 = vadd.f32 %v73_v11, %v23_v10 }
  0xcc   :  { %v111_v13 = vpop.f32.mrf.mxu0 }
  0xcd   :  { %81 = vst.msk [vmem:[#allocation2 + $0x8] sm:$0xff] %vm19_vm0, %v78_v12 }
  0xd0   :  { %v85_v15 = vld [vmem:[#allocation2] sm:$0xff] }
  0xd1   :  { %v94_v16 = vadd.f32 %v103_v14, %v85_v15 }
  0xd3   :  { %96 = vst.msk [vmem:[%s163_s3] sm:$0xff] %vm19_vm0, %v94_v16 }
  0xd4   :  { %v86_v17 = vld [vmem:[#allocation2 + $0x8] sm:$0xff] }
  0xd5   :  { %v95_v18 = vadd.f32 %v103_v14, %v86_v17 }
  0xd7   :  { %97 = vst.msk [vmem:[%s163_s3 + $0x8] sm:$0xff] %vm19_vm0, %v95_v18 }

// kernel: transformer_forward.8
= control target key start
LH: loop header
LB: loop body
LE: loop exit
PB: predicated region body
PF: predicated region fallthrough
CT: control target
= control target key end

     0   :  { %s1367_s24 = smov 0   ;;  %s1369_s25 = smov 0   ;;  %s1517_s0 = inlined_call_operand.vmem [shape: f32[16,32], index: 0, kind: input, shape index: {}]   ;;  %s1518_s1 = inlined_call_operand.vmem [shape: bf16[32,2048], index: 1, kind: input, shape index: {}]   ;;  %s1519_s2 = inlined_call_operand.vmem [shape: f32[1,2048], index: 2, kind: input, shape index: {}]   ;;  %s1520_s3 = inlined_call_operand.vmem [shape: bf16[2048,32], index: 3, kind: input, shape index: {}]   ;;  %s1521_s4 = inlined_call_operand.vmem [shape: f32[1,32], index: 4, kind: input, shape index: {}]   ;;  %s1522_s5 = inlined_call_operand.vmem [shape: f32[1,32], index: 5, kind: input, shape index: {}]   ;;  %s1523_s6 = inlined_call_operand.vmem [shape: f32[1,32], index: 6, kind: input, shape index: {}]   ;;  %s1524_s7 = inlined_call_operand.vmem [shape: f32[16,32], index: 7, kind: output, shape index: {}]  }
   0x1   :  { %s1371_s26 = smov 0   ;;  %s1373_s27 = smov 0  }
   0x2   :  { %s1375_s28 = smov 0  }
   0x3 LB: > { %s26_s29 = sadd.s32 1, %s1319_s27  ;;  %p69_p1 = scmp.ne.s32.totalorder %s1311_s25, %s1307_s24  ;;  %s1323_s28 = sphi %s1375_s28, %s17_s28   ;;  %s1319_s27 = sphi %s1373_s27, %s1528_s27   ;;  %s1315_s26 = sphi %s1371_s26, %s1527_s26   ;;  %s1311_s25 = sphi %s1369_s25, %s1526_s25   ;;  %s1307_s24 = sphi %s1367_s24, %s1525_s24  }
   0x4   : > { %p27_p0 = scmp.ge.s32.totalorder %s26_s29, 4  ;;  %p70_p2 = scmp.eq.s32.totalorder %s1323_s28, 0 }
   0x5   : > { %s62_s8 = sadd.s32 1, %s1311_s25  ;;  %p1090_p5 = scmp.ge.s32.totalorder %s1323_s28, 4 }
   0x6   : > { %s1530_s29 = smov (%p27_p0, %s26_s29), 0  ;;  %p71_p3 = por %p70_p2, %p69_p1 }
   0x7   : > { %s59_s30 = ssub.s32 %s1319_s27, %s1530_s29  ;;  %254 = sbr.rel (%p1090_p5) target bundleno = 20 (0x14), region = 32 }
   0x8   : > { %p60_p4 = scmp.eq.s32.totalorder %s59_s30, 0 }
   0xa   : > { %s1402_s9 = scalar_select %p60_p4, %s1311_s25, %s62_s8  }
   0xc   : > { %257 = sbr.rel (!%p71_p3) target bundleno = 20 (0x14), region = 36  ;;  %s259_s10 = sand.u32 (%p71_p3), 1, %s1311_s25  }
   0xd   : > { %s1150_s11 = sshll.u32 (%p71_p3), %s1319_s27, 4  ;;  %s1091_s12 = sshll.u32 (%p71_p3), %s259_s10, 6 }
   0xe   : > { %s264_s15 = scalar_lea.vmem (%p71_p3), %s1518_s1, %s1150_s11  ;;  %s261_s16 = scalar_lea.vmem (%p71_p3), [#allocation3], %s1091_s12 }
   0xf   : > { %v277_v0 = vld [vmem:[%s264_s15] sm:$0xff] (%p71_p3)  ;;  %v279_v1 = vld [vmem:[%s264_s15 + $0x8] sm:$0xff] (%p71_p3) }
  0x10   : > { %v281_v2 = vld [vmem:[%s264_s15 + $0x40] sm:$0xff] (%p71_p3)  ;;  %278 = vst [vmem:[%s261_s16] sm:$0xff] (%p71_p3), %v277_v0  ;;  %280 = vst [vmem:[%s261_s16 + $0x8] sm:$0xff] (%p71_p3), %v279_v1  ;;  %v283_v3 = vld [vmem:[%s264_s15 + $0x48] sm:$0xff] (%p71_p3) }
  0x11   : > { %282 = vst [vmem:[%s261_s16 + $0x10] sm:$0xff] %v281_v2  ;;  %v285_v4 = vld [vmem:[%s264_s15 + $0x80] sm:$0xff]  ;;  %v287_v5 = vld [vmem:[%s264_s15 + $0x88] sm:$0xff]  ;;  %284 = vst [vmem:[%s261_s16 + $0x18] sm:$0xff] %v283_v3 }
  0x12   : > { %286 = vst [vmem:[%s261_s16 + $0x20] sm:$0xff] %v285_v4  ;;  %288 = vst [vmem:[%s261_s16 + $0x28] sm:$0xff] %v287_v5  ;;  %v289_v6 = vld [vmem:[%s264_s15 + $0xc0] sm:$0xff]  ;;  %v291_v7 = vld [vmem:[%s264_s15 + $0xc8] sm:$0xff] }
  0x13   : > { %290 = vst [vmem:[%s261_s16 + $0x30] sm:$0xff] %v289_v6  ;;  %292 = vst [vmem:[%s261_s16 + $0x38] sm:$0xff] %v291_v7 }
  0x14 PF: > { %p1094_p6 = scmp.ge.s32.totalorder %s1323_s28, 1  ;;  %p314_p7 = scmp.lt.s32.totalorder %s1323_s28, 5 }
  0x16   : > { %p315_p8 = pnand %p1094_p6, %p314_p7 }
  0x17   : > { %s321_s17 = sand.u32 (!%p315_p8), 1, %s1307_s24   ;;  %s1096_s18 = sshll.u32 (!%p315_p8), %s1315_s26, 2 }
  0x18   : > { %318 = sbr.rel (%p315_p8) target bundleno = 780 (0x30c), region = 67  ;;  %s1095_s19 = sshll.u32 (!%p315_p8), %s321_s17, 6 }
  0x19   : > { %p374_p9 = scmp.lt.s32.totalorder (!%p315_p8), %s1096_s18, 15  ;;  %s1097_s20 = sshll.u32 (!%p315_p8), %s1315_s26, 6 }
  0x1a   : > { %p379_p10 = scmp.lt.s32.totalorder (!%p315_p8), %s1097_s20, 255  ;;  %s323_s24 = scalar_lea.vmem (!%p315_p8), [#allocation3], %s1095_s19 }
  0x1b   : > { %p1099_p11 = scmp.ne.s32.totalorder (!%p315_p8), %s1315_s26, 0 }
  0x1d   : > { %s1532_s18 = smov (!%p374_p9, %s1096_s18), 15  ;;  %s1534_s20 = smov (!%p379_p10, %s1097_s20), 255 }
  0x1e   : > { %s376_s23 = scalar_lea.vmem %s1519_s2, %s1532_s18  ;;  %s1098_s30 = sshll.u32 %s1534_s20, 2 }
  0x1f   : > { %s1424_s11 = scalar_lea.vmem %s1520_s3, %s1098_s30  ;;  %394 = sbr.rel (%p1099_p11) target bundleno = 38 (0x26), region = 75 }
  0x24   : > { %vm395_vm0 = vcmask 261120   ;;  %v1325_v8 = vmov 0.0  }
  0x25   : > { %396 = vst.msk [vmem:[#allocation2] sm:$0xff] %vm395_vm0, %v1325_v8  ;;  %397 = vst.msk [vmem:[#allocation2 + $0x8] sm:$0xff] %vm395_vm0, %v1325_v8 }
  0x26 PF: > { %v1237_v9 = vld [vmem:[%s323_s24 + $0x24] ss:$16 sps:$4 sm:$0xff]   ;;  %v1239_v10 = vld [vmem:[%s323_s24 + $0x2c] ss:$16 sps:$4 sm:$0xff]   ;;  %v1326_v11 = vmov 0   ;;  %vm471_vm1 = vcmask 261120   ;;  %v411_v53 = vlaneseq }
  0x27   : > { %507 = vmatprep.mubr.bf16.mxu0 %v1326_v11  ;;  %550 = vmatprep.mubr.bf16.mxu1 %v1326_v11  ;;  %v1241_v12 = vld [vmem:[%s323_s24 + $0x20] ss:$16 sps:$4 sm:$0xff]   ;;  %v1242_v13 = vld [vmem:[%s323_s24 + $0x28] ss:$16 sps:$4 sm:$0xff]   ;;  %v1243_v14 = vld [vmem:[%s323_s24 + $0x4] ss:$16 sps:$4 sm:$0xff]  }
  0x28   : > { %487 = vmatprep.subr.bf16.mxu0 %v1237_v9  ;;  %530 = vmatprep.subr.bf16.mxu1 %v1239_v10  ;;  %v1245_v15 = vld [vmem:[%s323_s24 + $0xc] ss:$16 sps:$4 sm:$0xff]   ;;  %v1247_v16 = vld [vmem:[%s323_s24] ss:$16 sps:$4 sm:$0xff]   ;;  %v1248_v17 = vld [vmem:[%s323_s24 + $0x8] ss:$16 sps:$4 sm:$0xff]  }
  0x29   : > { %488 = vmatpush1.bf16.msra.mxu0 %v1241_v12  ;;  %531 = vmatpush1.bf16.msra.mxu1 %v1242_v13  ;;  %v398_v18 = vld [vmem:[%s1517_s0] sm:$0xff]  ;;  %v399_v19 = vld [vmem:[%s1517_s0 + $0x8] sm:$0xff]  ;;  %v1249_v20 = vld [vmem:[%s1424_s11 + $0x78] sm:$0xff]   ;;  %v412_v54 = vshrl.u32 %v411_v53, 7  ;;  %p1142_p12 = scmp.ne.s32.totalorder %s1315_s26, 3 }
  0x2a   : > { %489 = vmatprep.subr.bf16.mxu0 %v1243_v14  ;;  %532 = vmatprep.subr.bf16.mxu1 %v1245_v15  ;;  %v400_v21 = vpack.c.bf16 %v399_v19, %v398_v18  ;;  %v1250_v22 = vld [vmem:[%s1424_s11 + $0xf8] sm:$0xff]   ;;  %v1253_v25 = vld [vmem:[%s1424_s11 + $0x70] sm:$0xff]   ;;  %v1257_v29 = vld [vmem:[%s1424_s11 + $0x68] sm:$0xff]  }
  0x2b   : > { %v1251_v23 = vld [vmem:[%s1424_s11 + $0x38] sm:$0xff]   ;;  %v1254_v26 = vld [vmem:[%s1424_s11 + $0xf0] sm:$0xff]   ;;  %v1258_v30 = vld [vmem:[%s1424_s11 + $0xe8] sm:$0xff]   ;;  %v417_v55 = vsub.s32 1, %v412_v54  ;;  %v425_v56 = vsub.s32 3, %v412_v54  ;;  %v413_v57 = vsub.s32 0, %v412_v54 }
  0x2c   : > { %v1252_v24 = vld [vmem:[%s1424_s11 + $0xb8] sm:$0xff]   ;;  %v1255_v27 = vld [vmem:[%s1424_s11 + $0x30] sm:$0xff]   ;;  %v1259_v31 = vld [vmem:[%s1424_s11 + $0x28] sm:$0xff]   ;;  %v421_v58 = vsub.s32 2, %v412_v54 }
  0x2d   : > { %490 = vmatpush1.bf16.msra.mxu0 %v1247_v16  ;;  %533 = vmatpush1.bf16.msra.mxu1 %v1248_v17  ;;  %v1256_v28 = vld [vmem:[%s1424_s11 + $0xb0] sm:$0xff]   ;;  %v1260_v32 = vld [vmem:[%s1424_s11 + $0xa8] sm:$0xff]   ;;  %v1261_v33 = vld [vmem:[%s1424_s11 + $0x60] sm:$0xff]  }
  0x2e   : > { %1151 = vmatprep.subr.bf16.mxu0 %v1249_v20  ;;  %1173 = vmatprep.subr.bf16.mxu1 %v1250_v22  ;;  %v1262_v34 = vld [vmem:[%s1424_s11 + $0xe0] sm:$0xff]   ;;  %v1265_v37 = vld [vmem:[%s1424_s11 + $0x58] sm:$0xff]   ;;  %v1269_v41 = vld [vmem:[%s1424_s11 + $0x50] sm:$0xff]  }
  0x2f   : > { %v1263_v35 = vld [vmem:[%s1424_s11 + $0x20] sm:$0xff]   ;;  %v1266_v38 = vld [vmem:[%s1424_s11 + $0xd8] sm:$0xff]   ;;  %v1270_v42 = vld [vmem:[%s1424_s11 + $0xd0] sm:$0xff]  }
  0x30   : > { %1108 = vmatmul.mubr.msk.bf16.vlgmr.msra.gmra.mxu0 %vm471_vm1, %v400_v21  ;;  %1109 = vmatmul.mubr.msk.bf16.vlgmr.msra.gmra.mxu1 %vm471_vm1, %v400_v21  ;;  %v1264_v36 = vld [vmem:[%s1424_s11 + $0xa0] sm:$0xff]   ;;  %v1267_v39 = vld [vmem:[%s1424_s11 + $0x18] sm:$0xff]   ;;  %v1271_v43 = vld [vmem:[%s1424_s11 + $0x10] sm:$0xff]  }
  0x31   : > { %1152 = vmatpush3.bf16.msra.mxu0 %v1251_v23  ;;  %1174 = vmatpush3.bf16.msra.mxu1 %v1252_v24  ;;  %v1268_v40 = vld [vmem:[%s1424_s11 + $0x98] sm:$0xff]   ;;  %v1272_v44 = vld [vmem:[%s1424_s11 + $0x90] sm:$0xff]   ;;  %v1273_v45 = vld [vmem:[%s1424_s11 + $0x48] sm:$0xff]  }
  0x32   : > { %1153 = vmatprep.subr.bf16.mxu0 %v1253_v25  ;;  %1175 = vmatprep.subr.bf16.mxu1 %v1254_v26  ;;  %v1274_v46 = vld [vmem:[%s1424_s11 + $0xc8] sm:$0xff]   ;;  %v1277_v49 = vld [vmem:[%s1424_s11 + $0x40] sm:$0xff]  }
  0x33   : > { %v1275_v47 = vld [vmem:[%s1424_s11 + $0x8] sm:$0xff]   ;;  %v1278_v50 = vld [vmem:[%s1424_s11 + $0xc0] sm:$0xff]  }
  0x34   : > { %v1276_v48 = vld [vmem:[%s1424_s11 + $0x88] sm:$0xff]   ;;  %v1279_v51 = vld [vmem:[%s1424_s11] sm:$0xff]  }
  0x35   : > { %1154 = vmatpush3.bf16.msra.mxu0 %v1255_v27  ;;  %1176 = vmatpush3.bf16.msra.mxu1 %v1256_v28  ;;  %v1280_v52 = vld [vmem:[%s1424_s11 + $0x80] sm:$0xff]  }
  0x36   : > { %1155 = vmatprep.subr.bf16.mxu0 %v1257_v29  ;;  %1177 = vmatprep.subr.bf16.mxu1 %v1258_v30  ;;  %v409_v59 = vld [vmem:[%s376_s23] sm:$0xf] }
  0x37   : > { %v418_v62 = vrot.slane %v409_v59, %v417_v55  ;;  %v426_v63 = vrot.slane %v409_v59, %v425_v56  ;;  %v414_v0 = vrot.slane %v409_v59, %v413_v57  ;;  %v422_v1 = vrot.slane %v409_v59, %v421_v58 }
  0x39   : > { %1156 = vmatpush3.bf16.msra.mxu0 %v1259_v31  ;;  %1178 = vmatpush3.bf16.msra.mxu1 %v1260_v32 }
  0x3a   : > { %1157 = vmatprep.subr.bf16.mxu0 %v1261_v33  ;;  %1179 = vmatprep.subr.bf16.mxu1 %v1262_v34  ;;  %v569_v34 = vld [vmem:[#allocation2] sm:$0xff] }
  0x3d   : > { %1158 = vmatpush3.bf16.msra.mxu0 %v1263_v35  ;;  %1180 = vmatpush3.bf16.msra.mxu1 %v1264_v36 }
  0x3e   : > { %1159 = vmatprep.subr.bf16.mxu0 %v1265_v37  ;;  %1181 = vmatprep.subr.bf16.mxu1 %v1266_v38 }
  0x41   : > { %1160 = vmatpush3.bf16.msra.mxu0 %v1267_v39  ;;  %1182 = vmatpush3.bf16.msra.mxu1 %v1268_v40 }
  0x42   : > { %1161 = vmatprep.subr.bf16.mxu0 %v1269_v41  ;;  %1183 = vmatprep.subr.bf16.mxu1 %v1270_v42 }
  0x45   : > { %1162 = vmatpush3.bf16.msra.mxu0 %v1271_v43  ;;  %1184 = vmatpush3.bf16.msra.mxu1 %v1272_v44  ;;  %v570_v43 = vld [vmem:[#allocation2 + $0x8] sm:$0xff] }
  0x46   : > { %1163 = vmatprep.subr.bf16.mxu0 %v1273_v45  ;;  %1185 = vmatprep.subr.bf16.mxu1 %v1274_v46 }
  0x49   : > { %1164 = vmatpush3.bf16.msra.mxu0 %v1275_v47  ;;  %1186 = vmatpush3.bf16.msra.mxu1 %v1276_v48 }
  0x4a   : > { %1165 = vmatprep.subr.bf16.mxu0 %v1277_v49  ;;  %1187 = vmatprep.subr.bf16.mxu1 %v1278_v50 }
  0x4d   : > { %1166 = vmatpush3.bf16.msra.mxu0 %v1279_v51  ;;  %1188 = vmatpush3.bf16.msra.mxu1 %v1280_v52 }
  0xf0   : > { %v509_v60 = vpop.f32.mrf.mxu0  ;;  %v552_v61 = vpop.f32.mrf.mxu1 }
  0xf1   : > { %v510_v10 = vadd.f32 %v509_v60, %v414_v0  ;;  %v553_v11 = vadd.f32 %v552_v61, %v422_v1 }
  0xf2   : > { %v511_v2 = vpop.f32.mrf.mxu0  ;;  %v554_v3 = vpop.f32.mrf.mxu1 }
  0xf3   : > { %v512_v6 = vadd.f32 %v511_v2, %v418_v62  ;;  %v555_v7 = vadd.f32 %v554_v3, %v426_v63  ;;  %v561_v22 = vmax.f32 %v510_v10, 0.0  ;;  %v563_v23 = vmax.f32 %v553_v11, 0.0 }
  0xf4   : > { %v513_v4 = vpop.f32.mrf.mxu0  ;;  %v556_v5 = vpop.f32.mrf.mxu1 }
  0xf5   : > { %v514_v8 = vadd.f32 %v513_v4, %v414_v0  ;;  %v557_v9 = vadd.f32 %v556_v5, %v422_v1  ;;  %v562_v18 = vmax.f32 %v512_v6, 0.0  ;;  %v564_v19 = vmax.f32 %v555_v7, 0.0 }
  0xf6   : > { %v515_v12 = vpop.f32.mrf.mxu0  ;;  %v558_v13 = vpop.f32.mrf.mxu1 }
  0xf7   : > { %v516_v14 = vadd.f32 %v515_v12, %v418_v62  ;;  %v559_v15 = vadd.f32 %v558_v13, %v426_v63  ;;  %v565_v16 = vmax.f32 %v514_v8, 0.0  ;;  %v567_v17 = vmax.f32 %v557_v9, 0.0 }
  0xf9   : > { %v566_v20 = vmax.f32 %v516_v14, 0.0  ;;  %v568_v21 = vmax.f32 %v559_v15, 0.0  ;;  %v571_v26 = vpack.c.bf16 %v565_v16, %v561_v22  ;;  %v573_v27 = vpack.c.bf16 %v567_v17, %v563_v23 }
  0xfb   : > { %v572_v24 = vpack.c.bf16 %v566_v20, %v562_v18  ;;  %v574_v25 = vpack.c.bf16 %v568_v21, %v564_v19 }
  0xfd   : > { %863 = vmatprep.mubr.bf16.mxu0 %v572_v24  ;;  %904 = vmatprep.mubr.bf16.mxu1 %v574_v25 }
  0xfe   : > { %864 = vmatmul.mubr.bf16.vlgmr.msra.gmra.mxu0 %v571_v26  ;;  %905 = vmatmul.mubr.bf16.vlgmr.msra.gmra.mxu1 %v573_v27 }
 0x1be   : > { %v1167_v28 = vpop.f32.mrf.mxu0  ;;  %v1189_v29 = vpop.f32.mrf.mxu1 }
 0x1c0   : > { %v1168_v30 = vpop.f32.mrf.mxu0  ;;  %v1190_v31 = vpop.f32.mrf.mxu1 }
 0x1c1   : > { %v1169_v32 = vadd.f32 %v1168_v30, %v1167_v28  ;;  %v1191_v33 = vadd.f32 %v1190_v31, %v1189_v29 }
 0x1c2   : > { %v1170_v35 = vpop.f32.mrf.mxu0  ;;  %v1192_v36 = vpop.f32.mrf.mxu1 }
 0x1c3   : > { %v907_v37 = vadd.f32 %v1191_v33, %v1169_v32 }
 0x1c4   : > { %v1171_v38 = vpop.f32.mrf.mxu0  ;;  %v1193_v39 = vpop.f32.mrf.mxu1 }
 0x1c5   : > { %v913_v40 = vadd.f32 %v907_v37, %v569_v34  ;;  %v1172_v41 = vadd.f32 %v1171_v38, %v1170_v35  ;;  %v1194_v42 = vadd.f32 %v1193_v39, %v1192_v36 }
 0x1c7   : > { %915 = vst.msk [vmem:[#allocation2] sm:$0xff] %vm471_vm1, %v913_v40  ;;  %v910_v44 = vadd.f32 %v1194_v42, %v1172_v41  ;;  %920 = sbr.rel (%p1142_p12) target bundleno = 780 (0x30c), region = 79 }
 0x1c9   : > { %v914_v45 = vadd.f32 %v910_v44, %v570_v43 }
 0x1cb   : > { %916 = vst.msk [vmem:[#allocation2 + $0x8] sm:$0xff] %vm471_vm1, %v914_v45 }
 0x1cc   : > { %v1143_v47 = vld [vmem:[%s1521_s4] ss:$0 sm:$0xff]  ;;  %v933_v51 = vld [vmem:[%s1517_s0 + $0x8] sm:$0xff] }
 0x1cd   : > { %v932_v48 = vld [vmem:[%s1517_s0] sm:$0xff] }
 0x1ce   : > { %v921_v46 = vld [vmem:[#allocation2] sm:$0xff] }
 0x1cf   : > { %v930_v49 = vadd.f32 %v1143_v47, %v921_v46  ;;  %v1144_v10 = vld [vmem:[%s1522_s5] ss:$0 sm:$0xff] }
 0x1d0   : > { %v1145_v12 = vld [vmem:[%s1523_s6] ss:$0 sm:$0xff] }
 0x1d1   : > { %v934_v53 = vadd.f32 %v932_v48, %v930_v49 }
 0x1d2   : > { %v922_v50 = vld [vmem:[#allocation2 + $0x8] sm:$0xff] }
 0x1d3   : > { %v931_v52 = vadd.f32 %v1143_v47, %v922_v50  ;;  %v936_v55 = vsel %vm471_vm1, %v934_v53, 0.0 }
 0x1d4   : > { %937 = vadd.xlane.f32.xlu0 %v936_v55 }
 0x1d5   : > { %v935_v54 = vadd.f32 %v933_v51, %v931_v52 }
 0x1d7   : > { %v939_v56 = vsel %vm471_vm1, %v935_v54, 0.0 }
 0x1d8   : > { %940 = vadd.xlane.f32.xlu0 %v939_v56 }
 0x25d   : > { %v938_v57 = vpop.xlane.xlu0 %937 }
 0x25e   : > { %v943_v58 = vmul.f32 0.03125, %v938_v57 }
 0x260   : > { %v945_v59 = vsub.f32 %v934_v53, %v943_v58 }
 0x261   : > { %v941_v60 = vpop.xlane.xlu0 %940 }
 0x262   : > { %v944_v61 = vmul.f32 0.03125, %v941_v60  ;;  %v947_v62 = vmul.f32 %v945_v59, %v945_v59 }
 0x264   : > { %v946_v63 = vsub.f32 %v935_v54, %v944_v61  ;;  %v949_v0 = vsel %vm471_vm1, %v947_v62, 0.0 }
 0x265   : > { %950 = vadd.xlane.f32.xlu1 %v949_v0 }
 0x266   : > { %v948_v1 = vmul.f32 %v946_v63, %v946_v63 }
 0x268   : > { %v952_v2 = vsel %vm471_vm1, %v948_v1, 0.0 }
 0x269   : > { %953 = vadd.xlane.f32.xlu1 %v952_v2 }
 0x2ee   : > { %v951_v3 = vpop.xlane.xlu1 %950 }
 0x2ef   : > { %v955_v4 = vmul.f32 0.03125, %v951_v3 }
 0x2f1   : > { %v957_v5 = vadd.f32 1e-05, %v955_v4 }
 0x2f2   : > { %v954_v6 = vpop.xlane.xlu1 %953 }
 0x2f3   : > { %1281 = vrsqrt.f32 %v957_v5  ;;  %v956_v7 = vmul.f32 0.03125, %v954_v6 }
 0x2f5   : > { %v958_v8 = vadd.f32 1e-05, %v956_v7 }
 0x2f7   : > { %1283 = vrsqrt.f32 %v958_v8 }
 0x300   : > { %v1282_v9 = vpop.eup %1281 }
 0x301   : > { %v961_v11 = vmul.f32 %v1282_v9, %v945_v59 }
 0x303   : > { %v970_v13 = vmul.f32 %v1144_v10, %v961_v11 }
 0x304   : > { %v1284_v14 = vpop.eup %1283 }
 0x305   : > { %v979_v15 = vadd.f32 %v1145_v12, %v970_v13  ;;  %v962_v16 = vmul.f32 %v1284_v14, %v946_v63 }
 0x307   : > { %981 = vst.msk [vmem:[%s1524_s7] sm:$0xff] %vm471_vm1, %v979_v15  ;;  %v971_v17 = vmul.f32 %v1144_v10, %v962_v16 }
 0x309   : > { %v980_v18 = vadd.f32 %v1145_v12, %v971_v17 }
 0x30b   : > { %982 = vst.msk [vmem:[%s1524_s7 + $0x8] sm:$0xff] %vm471_vm1, %v980_v18 }
 0x30c PF: > { %s17_s28 = sadd.s32 1, %s1323_s28   ;;  %s1525_s24 = smov %s1311_s25 }
 0x30d   : > { %p14_p13 = scmp.ge.s32.totalorder %s17_s28, 6   ;;  %s1526_s25 = smov %s1402_s9 }
 0x30e   : > { %s1527_s26 = smov %s1319_s27  ;;  %s1528_s27 = smov %s1530_s29 }
 0x30f   :  { %16 = sbr.rel (!%p14_p13) target bundleno = 3 (0x3), region = 123 }

// kernel: transformer_forward.7
= control target key start
LH: loop header
LB: loop body
LE: loop exit
PB: predicated region body
PF: predicated region fallthrough
CT: control target
= control target key end

     0   :  { %s1181_s24 = smov 0   ;;  %s1306_s0 = inlined_call_operand.vmem [shape: f32[2,8,32], index: 0, kind: input, shape index: {}]   ;;  %s1307_s1 = inlined_call_operand.vmem [shape: bf16[32,96], index: 1, kind: input, shape index: {}]   ;;  %s1308_s2 = inlined_call_operand.vmem [shape: f32[1,96], index: 2, kind: input, shape index: {}]   ;;  %s1309_s3 = inlined_call_operand.vmem [shape: bf16[32,32], index: 3, kind: input, shape index: {}]   ;;  %s1310_s4 = inlined_call_operand.vmem [shape: f32[1,32], index: 4, kind: input, shape index: {}]   ;;  %s1311_s5 = inlined_call_operand.vmem [shape: f32[1,32], index: 5, kind: input, shape index: {}]   ;;  %s1312_s6 = inlined_call_operand.vmem [shape: f32[1,32], index: 6, kind: input, shape index: {}]   ;;  %s1313_s7 = inlined_call_operand.vmem [shape: f32[2,8,32], index: 7, kind: output, shape index: {}]  }
   0x1 LB: > { %s958_s25 = sadd.s32 4294967295, %s1123_s24   ;;  %p962_p0 = scmp.ge.s32.totalorder %s1123_s24, 1  ;;  %s1123_s24 = sphi %s1181_s24, %s17_s24  }
   0x2   : > { %p236_p1 = scmp.lt.s32.totalorder %s1123_s24, 3 }
   0x4   : > { %p237_p2 = pnand %p962_p0, %p236_p1 }
   0x5   : > { %p266_p3 = scmp.lt.s32.totalorder (!%p237_p2), %s958_s25, 1  ;;  %s1127_s13 = smov (!%p237_p2), 96  }
   0x6   : > { %240 = sbr.rel (%p237_p2) target bundleno = 1564 (0x61c), region = 48  ;;  %s1128_s14 = smov (!%p237_p2), 120  }
   0x7   : > { %s1129_s15 = smov (!%p237_p2), 88   ;;  %s1130_s16 = smov (!%p237_p2), 80  }
   0x8   : > { %s1131_s17 = smov (!%p237_p2), 112   ;;  %s1132_s18 = smov (!%p237_p2), 72  }
   0x9   : > { %s1133_s19 = smov (!%p237_p2), 104   ;;  %s1134_s20 = smov (!%p237_p2), 56  }
   0xa   : > { %s1135_s21 = smov (!%p237_p2), 64   ;;  %s1136_s22 = smov (!%p237_p2), 40  }
   0xb   : > { %v1095_v0 = vld [vmem:[%s1307_s1 + $0x8] sm:$0xff]   ;;  %v1125_v1 = vmov 0.0   ;;  %v1096_v2 = vld [vmem:[%s1307_s1] sm:$0xff]   ;;  %vm1126_vm0 = vmmov 0   ;;  %s1315_s25 = smov (!%p266_p3, %s958_s25), 1  ;;  %vm307_vm1 = vcmask 261120  }
   0xc   : > { %1007 = vmatprep.subr.bf16.mxu0 %v1125_v1  ;;  %1015 = vmatprep.subr.bf16.mxu1 %v1125_v1  ;;  %s963_s30 = sshll.u32 %s1315_s25, 3  ;;  %v965_v5 = vld [vmem:[%s1308_s2] ss:$0 sm:$0xff]  ;;  %vm357_vm2 = vcmask 64512   ;;  %s1137_s23 = smov 48   ;;  %vm419_vm3 = vcmask 1043456  }
   0xd   : > { %1008 = vmatpush3.bf16.msra.mxu0 %v1095_v0  ;;  %1011 = vmatprep.mubr.msk.bf16.mxu0 %vm1126_vm0, %v1125_v1  ;;  %s269_s10 = scalar_lea.vmem %s1306_s0, %s963_s30  ;;  %s1138_s26 = smov 8   ;;  %vm809_vm4 = vcmask 130048   ;;  %vm811_vm5 = vcmask 195584  }
   0xe   : > { %1009 = vmatprep.subr.bf16.mxu0 %v1125_v1  ;;  %1017 = vmatprep.mubr.msk.bf16.mxu1 %vm1126_vm0, %v1125_v1  ;;  %v1211_v3 = vld [vmem:[%s269_s10] sm:$0xff]  ;;  %s1139_s9 = smov 16   ;;  %s1140_s10 = smov 24  }
   0xf   : > { %v288_v4 = vpack.c.bf16 %v1211_v3, %v1211_v3 }
  0x11   : > { %1010 = vmatpush3.bf16.msra.mxu0 %v1096_v2 }
  0x12   : > { %1021 = vmatprep.subr.bf16.mxu0 %v1125_v1 }
  0x14   : > { %1012 = vmatmul.mubr.msk.bf16.vlgmr.msra.gmra.mxu0 %vm307_vm1, %v288_v4 }
  0x15   : > { %1023 = vmatprep.mubr.msk.bf16.mxu0 %vm1126_vm0, %v1125_v1 }
  0xd4   : > { %v345_v6 = vpop.f32.mrf.mxu0 }
  0xd5   : > { %v346_v7 = vadd.f32 %v965_v5, %v345_v6 }
  0xd6   : > { %v1013_v8 = vpop.f32.mrf.mxu0 }
  0xd7   : > { %v351_v9 = vmul.f32 0.35355338, %v346_v7  ;;  %v1221_v10 = vpack.c.bf16 %v346_v7, %v346_v7 }
  0xd8   : > { %v348_v11 = vpop.f32.mrf.mxu0 }
  0xd9   : > { %v352_v12 = vpack.c.bf16 %v351_v9, %v351_v9  ;;  %355 = vrot.lane.b32.xlu0 %v1221_v10, %s1127_s13 }
  0xda   : > { %v1014_v13 = vpop.f32.mrf.mxu0 }
  0xdb   : > { %466 = vrot.lane.b32.xlu1 %v352_v12, %s1128_s14 }
  0xdd   : > { %468 = vrot.lane.b32.xlu0 %v1221_v10, %s1129_s15 }
  0xdf   : > { %578 = vrot.lane.b32.xlu1 %v1221_v10, %s1130_s16 }
  0xe1   : > { %576 = vrot.lane.b32.xlu0 %v352_v12, %s1131_s17 }
  0xe3   : > { %688 = vrot.lane.b32.xlu1 %v1221_v10, %s1132_s18 }
  0xe5   : > { %686 = vrot.lane.b32.xlu0 %v352_v12, %s1133_s19  ;;  %s273_s19 = scalar_lea.vmem %s1313_s7, %s963_s30 }
 0x14b   : > { %v356_v14 = vpop.permute.xlu0 %355 }
 0x14c   : > { %v362_v15 = vsel %vm357_vm2, %v356_v14, 0 }
 0x14d   : > { %1016 = vmatpush3.bf16.xpose.msra.mxu1 %v362_v15  ;;  %v467_v17 = vpop.permute.xlu1 %466 }
 0x14e   : > { %1027 = vmatprep.subr.bf16.mxu1 %v1125_v1 }
 0x14f   : > { %v469_v16 = vpop.permute.xlu0 %468 }
 0x150   : > { %v474_v18 = vsel %vm357_vm2, %v469_v16, 0 }
 0x151   : > { %v579_v19 = vpop.permute.xlu1 %578 }
 0x152   : > { %v584_v20 = vsel %vm357_vm2, %v579_v19, 0 }
 0x153   : > { %v577_v22 = vpop.permute.xlu0 %576 }
 0x154   : > { %1018 = vmatmul.mubr.msk.bf16.vlgmr.msra.gmra.mxu1 %vm357_vm2, %v352_v12 }
 0x155   : > { %1028 = vmatpush3.bf16.xpose.msra.mxu1 %v474_v18  ;;  %1029 = vmatprep.mubr.msk.bf16.mxu1 %vm1126_vm0, %v1125_v1  ;;  %v689_v21 = vpop.permute.xlu1 %688 }
 0x156   : > { %1039 = vmatprep.subr.bf16.mxu1 %v1125_v1  ;;  %v694_v23 = vsel %vm357_vm2, %v689_v21, 0 }
 0x157   : > { %v687_v24 = vpop.permute.xlu0 %686 }
 0x15c   : > { %1030 = vmatmul.mubr.msk.bf16.vlgmr.msra.gmra.mxu1 %vm357_vm2, %v467_v17 }
 0x15d   : > { %1040 = vmatpush3.bf16.xpose.msra.mxu1 %v584_v20  ;;  %1041 = vmatprep.mubr.msk.bf16.mxu1 %vm1126_vm0, %v1125_v1 }
 0x15e   : > { %1051 = vmatprep.subr.bf16.mxu1 %v1125_v1 }
 0x164   : > { %1042 = vmatmul.mubr.msk.bf16.vlgmr.msra.gmra.mxu1 %vm357_vm2, %v577_v22 }
 0x165   : > { %1052 = vmatpush3.bf16.xpose.msra.mxu1 %v694_v23  ;;  %1053 = vmatprep.mubr.msk.bf16.mxu1 %vm1126_vm0, %v1125_v1 }
 0x166   : > { %1063 = vmatprep.subr.bf16.mxu1 %v1125_v1 }
 0x16c   : > { %1054 = vmatmul.mubr.msk.bf16.vlgmr.msra.gmra.mxu1 %vm357_vm2, %v687_v24 }
 0x16d   : > { %1067 = vmatprep.mubr.msk.bf16.mxu1 %vm1126_vm0, %v1125_v1 }
 0x214   : > { %v398_v25 = vpop.f32.mrf.mxu1 }
 0x215   : > { %v404_v26 = vsel %vm357_vm2, %v398_v25, -inf }
 0x216   : > { %405 = vmax.xlane.f32.xlu1 %v404_v26  ;;  %v1019_v27 = vpop.f32.mrf.mxu1 }
 0x217   : > { %v1097_v27 = vld [vmem:[%s1309_s3 + $0x8] sm:$0xff]  }
 0x218   : > { %v401_v28 = vpop.f32.mrf.mxu1  ;;  %1064 = vmatpush3.bf16.msra.mxu1 %v1097_v27 }
 0x219   : > { %1065 = vmatprep.subr.bf16.mxu1 %v1125_v1 }
 0x21a   : > { %v1020_v29 = vpop.f32.mrf.mxu1 }
 0x21c   : > { %v510_v30 = vpop.f32.mrf.mxu1 }
 0x21d   : > { %v516_v31 = vsel %vm357_vm2, %v510_v30, -inf }
 0x21e   : > { %517 = vmax.xlane.f32.xlu0 %v516_v31  ;;  %v1031_v32 = vpop.f32.mrf.mxu1  ;;  %v1098_v31 = vld [vmem:[%s1309_s3] sm:$0xff]  }
 0x21f   : > { %1066 = vmatpush3.bf16.msra.mxu1 %v1098_v31 }
 0x220   : > { %v513_v33 = vpop.f32.mrf.mxu1 }
 0x222   : > { %v1032_v34 = vpop.f32.mrf.mxu1 }
 0x224   : > { %v620_v35 = vpop.f32.mrf.mxu1 }
 0x225   : > { %v626_v36 = vsel %vm357_vm2, %v620_v35, -inf }
 0x226   : > { %627 = vmax.xlane.f32.xlu0 %v626_v36  ;;  %v1043_v37 = vpop.f32.mrf.mxu1 }
 0x227   : > { %526 = vrot.lane.b32.xlu1 %v1221_v10, %s1134_s20 }
 0x228   : > { %v623_v38 = vpop.f32.mrf.mxu1 }
 0x22a   : > { %v1044_v39 = vpop.f32.mrf.mxu1 }
 0x22c   : > { %v730_v40 = vpop.f32.mrf.mxu1 }
 0x22d   : > { %v736_v44 = vsel %vm357_vm2, %v730_v40, -inf }
 0x22e   : > { %v1055_v41 = vpop.f32.mrf.mxu1 }
 0x230   : > { %v733_v42 = vpop.f32.mrf.mxu1 }
 0x232   : > { %v1056_v43 = vpop.f32.mrf.mxu1 }
 0x23c   : > { %414 = vrot.lane.b32.xlu0 %v1221_v10, %s1135_s21 }
 0x240   : > { %746 = vrot.lane.b32.xlu0 %v1221_v10, %s1136_s22 }
 0x24b   : > { %737 = vmax.xlane.f32.xlu1 %v736_v44 }
 0x25c   : > { %636 = vrot.lane.b32.xlu1 %v1221_v10, %s1137_s23 }
 0x29f   : > { %v406_v45 = vpop.xlane.xlu1 %405 }
 0x2a0   : > { %v407_v46 = vsub.f32 %v398_v25, %v406_v45 }
 0x2a2   : > { %v408_v47 = vmul.f32 1.442695, %v407_v46 }
 0x2a3   : > { %v527_v57 = vpop.permute.xlu1 %526 }
 0x2a4   : > { %1099 = vpow2.f32 %v408_v47  ;;  %v532_v59 = vsel %vm419_vm3, %v527_v57, 0 }
 0x2a7   : > { %v518_v48 = vpop.xlane.xlu0 %517 }
 0x2a8   : > { %v519_v49 = vsub.f32 %v510_v30, %v518_v48 }
 0x2aa   : > { %v520_v50 = vmul.f32 1.442695, %v519_v49 }
 0x2ac   : > { %1101 = vpow2.f32 %v520_v50 }
 0x2af   : > { %v628_v51 = vpop.xlane.xlu0 %627 }
 0x2b0   : > { %v629_v52 = vsub.f32 %v620_v35, %v628_v51  ;;  %v977_v51 = vld [vmem:[%s1310_s4] ss:$0 sm:$0xff] }
 0x2b1   : > { %v1100_v54 = vpop.eup %1099 }
 0x2b2   : > { %v630_v53 = vmul.f32 1.442695, %v629_v52  ;;  %v413_v58 = vpack.c.bf16 %v1100_v54, %v1100_v54  ;;  %v410_v62 = vsel %vm357_vm2, %v1100_v54, 0.0 }
 0x2b3   : > { %v415_v55 = vpop.permute.xlu0 %414 }
 0x2b4   : > { %1103 = vpow2.f32 %v630_v53  ;;  %v421_v56 = vsel %vm419_vm3, %v415_v55, 0 }
 0x2b5   : > { %1022 = vmatpush3.bf16.msra.mxu0 %v421_v56 }
 0x2b6   : > { %1033 = vmatprep.subr.bf16.mxu0 %v1125_v1 }
 0x2b7   : > { %v747_v9 = vpop.permute.xlu0 %746 }
 0x2b8   : > { %1024 = vmatmul.mubr.msk.bf16.vlgmr.msra.gmra.mxu0 %vm357_vm2, %v413_v58  ;;  %v752_v11 = vsel %vm419_vm3, %v747_v9, 0 }
 0x2b9   : > { %v1102_v60 = vpop.eup %1101  ;;  %1034 = vmatpush3.bf16.msra.mxu0 %v532_v59  ;;  %1035 = vmatprep.mubr.msk.bf16.mxu0 %vm1126_vm0, %v1125_v1 }
 0x2ba   : > { %v522_v61 = vsel %vm357_vm2, %v1102_v60, 0.0  ;;  %1045 = vmatprep.subr.bf16.mxu0 %v1125_v1  ;;  %v525_v63 = vpack.c.bf16 %v1102_v60, %v1102_v60 }
 0x2bb   : > { %523 = vadd.xlane.f32.xlu1 %v522_v61 }
 0x2bf   : > { %411 = vadd.xlane.f32.xlu1 %v410_v62 }
 0x2c0   : > { %1036 = vmatmul.mubr.msk.bf16.vlgmr.msra.gmra.mxu0 %vm357_vm2, %v525_v63 }
 0x2c1   : > { %v1104_v0 = vpop.eup %1103  ;;  %1047 = vmatprep.mubr.msk.bf16.mxu0 %vm1126_vm0, %v1125_v1 }
 0x2c2   : > { %v632_v2 = vsel %vm357_vm2, %v1104_v0, 0.0  ;;  %v635_v10 = vpack.c.bf16 %v1104_v0, %v1104_v0 }
 0x2c3   : > { %633 = vadd.xlane.f32.xlu0 %v632_v2 }
 0x2d4   : > { %v738_v4 = vpop.xlane.xlu1 %737 }
 0x2d5   : > { %v739_v5 = vsub.f32 %v730_v40, %v738_v4 }
 0x2d7   : > { %v740_v6 = vmul.f32 1.442695, %v739_v5 }
 0x2d8   : > { %v637_v7 = vpop.permute.xlu1 %636 }
 0x2d9   : > { %1105 = vpow2.f32 %v740_v6  ;;  %v642_v8 = vsel %vm419_vm3, %v637_v7, 0  ;;  %v982_v7 = vld [vmem:[%s1312_s6] ss:$0 sm:$0xff] }
 0x2da   : > { %1046 = vmatpush3.bf16.msra.mxu0 %v642_v8 }
 0x2db   : > { %1057 = vmatprep.subr.bf16.mxu0 %v1125_v1 }
 0x2dd   : > { %1048 = vmatmul.mubr.msk.bf16.vlgmr.msra.gmra.mxu0 %vm357_vm2, %v635_v10 }
 0x2de   : > { %1058 = vmatpush3.bf16.msra.mxu0 %v752_v11  ;;  %1059 = vmatprep.mubr.msk.bf16.mxu0 %vm1126_vm0, %v1125_v1 }
 0x2e6   : > { %v1106_v12 = vpop.eup %1105 }
 0x2e7   : > { %v742_v13 = vsel %vm357_vm2, %v1106_v12, 0.0  ;;  %v745_v14 = vpack.c.bf16 %v1106_v12, %v1106_v12 }
 0x2e8   : > { %743 = vadd.xlane.f32.xlu0 %v742_v13 }
 0x2e9   : > { %1060 = vmatmul.mubr.msk.bf16.vlgmr.msra.gmra.mxu0 %vm357_vm2, %v745_v14 }
 0x344   : > { %v524_v15 = vpop.xlane.xlu1 %523 }
 0x345   : > { %1107 = vrcp.f32 %v524_v15 }
 0x348   : > { %v412_v41 = vpop.xlane.xlu1 %411 }
 0x34c   : > { %v634_v26 = vpop.xlane.xlu0 %633 }
 0x34d   : > { %1109 = vrcp.f32 %v634_v26 }
 0x352   : > { %v1108_v20 = vpop.eup %1107 }
 0x35a   : > { %v1110_v29 = vpop.eup %1109 }
 0x371   : > { %v744_v28 = vpop.xlane.xlu0 %743 }
 0x372   : > { %1111 = vrcp.f32 %v744_v28 }
 0x373   : > { %1113 = vrcp.f32 %v412_v41 }
 0x378   : > { %v457_v16 = vpop.f32.mrf.mxu0 }
 0x37a   : > { %v1025_v17 = vpop.f32.mrf.mxu0 }
 0x37c   : > { %v460_v18 = vpop.f32.mrf.mxu0 }
 0x37e   : > { %v1026_v19 = vpop.f32.mrf.mxu0 }
 0x37f   : > { %v1112_v36 = vpop.eup %1111 }
 0x380   : > { %v568_v21 = vpop.f32.mrf.mxu0  ;;  %v1114_v42 = vpop.eup %1113 }
 0x381   : > { %v575_v22 = vmul.f32 %v1108_v20, %v568_v21  ;;  %v464_v45 = vmul.f32 %v1114_v42, %v457_v16 }
 0x382   : > { %v1037_v23 = vpop.f32.mrf.mxu0 }
 0x383   : > { %797 = vrot.lane.b32.xlu0 %v575_v22, %s1138_s26 }
 0x384   : > { %v571_v24 = vpop.f32.mrf.mxu0 }
 0x386   : > { %v1038_v25 = vpop.f32.mrf.mxu0 }
 0x39d   : > { %v678_v30 = vpop.f32.mrf.mxu0 }
 0x39e   : > { %v685_v32 = vmul.f32 %v1110_v29, %v678_v30 }
 0x39f   : > { %v1049_v33 = vpop.f32.mrf.mxu0 }
 0x3a0   : > { %801 = vrot.lane.b32.xlu1 %v685_v32, %s1139_s9 }
 0x3a1   : > { %v681_v34 = vpop.f32.mrf.mxu0 }
 0x3a3   : > { %v1050_v35 = vpop.f32.mrf.mxu0 }
 0x3a9   : > { %v788_v37 = vpop.f32.mrf.mxu0 }
 0x3aa   : > { %v795_v38 = vmul.f32 %v1112_v36, %v788_v37 }
 0x3ab   : > { %v1061_v39 = vpop.f32.mrf.mxu0 }
 0x3ac   : > { %805 = vrot.lane.b32.xlu1 %v795_v38, %s1140_s10 }
 0x3ad   : > { %v791_v1 = vpop.f32.mrf.mxu0 }
 0x3af   : > { %v1062_v40 = vpop.f32.mrf.mxu0 }
 0x3f5   : > { %v798_v43 = vpop.permute.xlu0 %797 }
 0x3f6   : > { %v808_v46 = vsel %vm357_vm2, %v464_v45, %v798_v43 }
 0x412   : > { %v802_v44 = vpop.permute.xlu1 %801 }
 0x413   : > { %v810_v47 = vsel %vm809_vm4, %v808_v46, %v802_v44 }
 0x41e   : > { %v806_v48 = vpop.permute.xlu1 %805 }
 0x41f   : > { %v812_v49 = vsel %vm811_vm5, %v810_v47, %v806_v48 }
 0x420   : > { %v813_v50 = vpack.c.bf16 %v812_v49, %v812_v49 }
 0x422   : > { %1068 = vmatmul.mubr.msk.bf16.vlgmr.msra.gmra.mxu1 %vm307_vm1, %v813_v50 }
 0x4e2   : > { %v869_v52 = vpop.f32.mrf.mxu1 }
 0x4e3   : > { %v870_v53 = vadd.f32 %v977_v51, %v869_v52 }
 0x4e4   : > { %v1069_v54 = vpop.f32.mrf.mxu1 }
 0x4e5   : > { %v875_v55 = vadd.f32 %v870_v53, %v1211_v3  ;;  %v981_v3 = vld [vmem:[%s1311_s5] ss:$0 sm:$0xff] }
 0x4e6   : > { %v872_v56 = vpop.f32.mrf.mxu1 }
 0x4e7   : > { %v876_v57 = vsel %vm307_vm1, %v875_v55, 0.0 }
 0x4e8   : > { %877 = vadd.xlane.f32.xlu0 %v876_v57  ;;  %v1070_v58 = vpop.f32.mrf.mxu1 }
 0x571   : > { %v878_v59 = vpop.xlane.xlu0 %877 }
 0x572   : > { %v880_v60 = vmul.f32 0.03125, %v878_v59 }
 0x574   : > { %v881_v61 = vsub.f32 %v875_v55, %v880_v60 }
 0x576   : > { %v882_v62 = vmul.f32 %v881_v61, %v881_v61 }
 0x578   : > { %v883_v63 = vsel %vm307_vm1, %v882_v62, 0.0 }
 0x579   : > { %884 = vadd.xlane.f32.xlu1 %v883_v63 }
 0x602   : > { %v885_v0 = vpop.xlane.xlu1 %884 }
 0x603   : > { %v886_v2 = vmul.f32 0.03125, %v885_v0 }
 0x605   : > { %v887_v4 = vadd.f32 1e-05, %v886_v2 }
 0x607   : > { %1115 = vrsqrt.f32 %v887_v4 }
 0x614   : > { %v1116_v5 = vpop.eup %1115 }
 0x615   : > { %v889_v6 = vmul.f32 %v1116_v5, %v881_v61 }
 0x617   : > { %v896_v8 = vmul.f32 %v981_v3, %v889_v6 }
 0x619   : > { %v903_v9 = vadd.f32 %v982_v7, %v896_v8 }
 0x61b   : > { %904 = vst.msk [vmem:[%s273_s19] sm:$0xff] %vm307_vm1, %v903_v9 }
 0x61c PF: > { %s17_s24 = sadd.s32 1, %s1123_s24  }
 0x61d   : > { %p14_p4 = scmp.ge.s32.totalorder %s17_s24, 4  }
 0x61f   :  { %16 = sbr.rel (!%p14_p4) target bundleno = 1 (0x1), region = 78 }

// kernel: transformer_forward.11
= control target key start
LH: loop header
LB: loop body
LE: loop exit
PB: predicated region body
PF: predicated region fallthrough
CT: control target
= control target key end

     0   :  { %v157_v1 = vmov 0.0   ;;  %vm158_vm0 = vmmov 0   ;;  %vm20_vm1 = vcmask 56320   ;;  %s198_s0 = inlined_call_operand.vmem [shape: f32[8,32], index: 0, kind: input, shape index: {}]   ;;  %s199_s1 = inlined_call_operand.vmem [shape: bf16[32,7], index: 1, kind: input, shape index: {}]   ;;  %s200_s2 = inlined_call_operand.vmem [shape: f32[1,7], index: 2, kind: input, shape index: {}]   ;;  %s201_s3 = inlined_call_operand.hbm [shape: f32[8,7], index: 3, kind: output, shape index: {}]  }
   0x1   :  { %v133_v0 = vld [vmem:[%s199_s1 + $0x8] sm:$0xff]   ;;  %122 = vmatprep.subr.bf16.mxu0 %v157_v1  ;;  %v134_v2 = vld [vmem:[%s199_s1] sm:$0xff]   ;;  %126 = vmatprep.mubr.msk.bf16.mxu0 %vm158_vm0, %v157_v1 }
   0x2   :  { %123 = vmatpush3.bf16.msra.mxu0 %v133_v0  ;;  %v23_v3 = vld [vmem:[%s198_s0] sm:$0xff] }
   0x3   :  { %8 = vsyncpa [#allocation4], 0  ;;  %124 = vmatprep.subr.bf16.mxu0 %v157_v1  ;;  %21 = vst.msk [vmem:[#allocation2] sm:$0xff] %vm20_vm1, %v157_v1  ;;  %v24_v4 = vpack.c.bf16 %v23_v3, %v23_v3  ;;  %vm41_vm2 = vcmask 261120   ;;  %v118_v11 = vld [vmem:[%s200_s2] ss:$0 sm:$0xff] }
   0x4   :  { %s159_s0 = smov [#allocation3]  }
   0x5   :  { %s107_s19 = sshll.u32 %s159_s0, 4  ;;  %s108_s19 = int_to_ptr.vmem [resolvable:$true] %s107_s19 }
   0x6   :  { %125 = vmatpush3.bf16.msra.mxu0 %v134_v2  ;;  %s135_s20 = scalar_lea.vmem %s108_s19, 128  ;;  %p140_p1 = scmp.lt.s32.totalorder %s108_s19, %s108_s19 }
   0x7   :  { %p136_p0 = scmp.ne.s32.totalorder %s108_s19, %s135_s20  ;;  %p141_p2 = scmp.lt.s32.totalorder %s135_s20, %s135_s20 }
   0x9   :  { %127 = vmatmul.mubr.msk.bf16.vlgmr.msra.gmra.mxu0 %vm41_vm2, %v24_v4  ;;  %p142_p3 = por %p141_p2, %p140_p1 }
   0xa   :  { %v22_v5 = vld [vmem:[#allocation2] sm:$0xff] }
   0xb   :  { %p143_p4 = pnand %p142_p3, %p136_p0 }
  0xc9   :  { %v79_v6 = vpop.f32.mrf.mxu0 }
  0xca   :  { %v85_v7 = vadd.f32 %v79_v6, %v22_v5 }
  0xcb   :  { %v128_v8 = vpop.f32.mrf.mxu0 }
  0xcc   :  { %87 = vst.msk [vmem:[#allocation2] sm:$0xff] %vm20_vm1, %v85_v7 }
  0xcd   :  { %v82_v9 = vpop.f32.mrf.mxu0 }
  0xcf   :  { %v129_v10 = vpop.f32.mrf.mxu0 }
  0xd3   :  { %v91_v12 = vld [vmem:[#allocation2] sm:$0xff] }
  0xd4   :  { %v99_v13 = vadd.f32 %v118_v11, %v91_v12 }
  0xd6   :  { %100 = vst.msk [vmem:[#allocation3] sm:$0xff] %vm20_vm1, %v99_v13 }
  0xd7   :  { %146 = shalt.err (!%p143_p4)
}
  0xd8   :  { %110 = dma.vmem_to_hbm [thread:$0]  %s108_s19, 128, %s201_s3, [#allocation4]  }
  0xd9   :  { %155 = dma.done.wait [#allocation4], 128  }
  0xda   :  { %156 = vsyncadd [#allocation4], 4294967168 }
  0xdb   :  { %114 = vsyncpa [#allocation4], 1 }

</bundles_post_ra>
